<compile_context>
chip_gen: v7x
topology: tpu7x:2x2x1
jax: 0.10.0
libtpu: 0.0.40
codegen_flags: <defaults>
</compile_context>

<pallas_src>
import functools

import jax
import jax.numpy as jnp
import numpy as np
from jax.experimental import pallas as pl
from jax.experimental.pallas import tpu as pltpu


def _round_up(x, m):
    return ((x + m - 1) // m) * m


def _pick_row_tile(H, W, Cin, Cp, budget_bytes=24 << 20):
    """Largest divisor TH of H whose double-buffered blocks fit the VMEM budget.

    Budget (24 MiB) keeps double-buffered in/out blocks well inside v7x's
    64 MiB physical VMEM while allowing large row tiles on realistic shapes
    (v5e/v6e have more headroom).
    """
    for th in range(H, 0, -1):
        if H % th:
            continue
        if th != H and (th * W) % 8 != 0:          # output-block sublane rule
            continue
        in_b = 2 * (th + 2) * (W + 2) * Cin * 2     # bf16 halo block, 2 buffers
        out_b = 2 * th * W * Cp * 4                 # f32 output block, 2 buffers
        if in_b + out_b <= budget_bytes:
            return th
    return H


def _conv_bn_relu_kernel(x_ref, w_ref, sh_ref, o_ref, *, TH, W, Cin, Cp):
    # x_ref : (1, TH+2, W+2, Cin) bf16 halo'd activation tile
    # w_ref : (9, Cin, Cp)        bf16 per-tap weight matrices (BN scale folded in)
    # sh_ref: (1, Cp)             f32 folded conv-bias + BN shift
    # o_ref : (1, TH*W, Cp)       f32 lane-dense output tile
    xb = x_ref[0]                                   # (TH+2, W+2, Cin)
    acc = None
    for kh in range(3):
        for kw in range(3):
            win = xb[kh:kh + TH, kw:kw + W, :]      # (TH, W, Cin) shifted tap
            win2 = win.reshape(TH * W, Cin)
            part = jnp.dot(win2, w_ref[kh * 3 + kw],
                           preferred_element_type=jnp.float32)
            acc = part if acc is None else acc + part
    y = acc + sh_ref[0:1, :]                        # (TH*W, Cp) + (1, Cp)
    o_ref[0] = jnp.maximum(y, 0.0).astype(o_ref.dtype)


def conv_block_forward(x_nchw, params):
    """Eval-mode ConvBlock forward. x_nchw: (N, Cin, H, W) f32 -> (N, Cout, H, W) f32."""
    w = params["conv_w"]                 # (Cout, Cin, 3, 3)  PyTorch OIHW
    b = params["conv_b"]                 # (Cout,)
    gamma, beta = params["bn_gamma"], params["bn_beta"]
    mean, var = params["bn_mean"], params["bn_var"]
    eps = 1e-5

    N, Cin, H, W = x_nchw.shape
    Cout = w.shape[0]
    Cp = _round_up(Cout, 128)            # lane-dense output channel count

    # --- glue (1x activation traffic): bf16 NCHW -> NHWC, zero pad ----------
    # TODO(synk): if the surrounding network produces/consumes NHWC these two
    # transposes can be dropped entirely.
    x = jnp.transpose(x_nchw.astype(jnp.bfloat16), (0, 2, 3, 1))   # (N,H,W,Cin)
    xp = jnp.pad(x, ((0, 0), (1, 1), (1, 1), (0, 0)))              # (N,H+2,W+2,Cin)

    TH = _pick_row_tile(H, W, Cin, Cp)
    nt = H // TH

    # Halo-expanded row tiles: each TH-row tile carries its own 2-row halo.
    if nt == 1:
        xt = xp[:, None]
    else:
        xt = jnp.stack([xp[:, t * TH:t * TH + TH + 2] for t in range(nt)],
                       axis=1)
    xt = xt.reshape(N * nt, TH + 2, W + 2, Cin)

    # Fold BN running stats into the conv weights / a per-channel shift (f32).
    scale = gamma / jnp.sqrt(var + eps)                             # (Cout,)
    shift = beta + (b - mean) * scale                               # (Cout,)

    # Weights: OIHW -> (kh, kw, Cin, Cout) -> scale fold -> (9, Cin, Cp) bf16.
    w_taps = jnp.transpose(w, (2, 3, 1, 0)).reshape(9, Cin, Cout)
    w_taps = w_taps * scale.reshape(1, 1, Cout)                     # f32 fold
    w_taps = jnp.pad(w_taps, ((0, 0), (0, 0), (0, Cp - Cout))).astype(jnp.bfloat16)

    sh = jnp.pad(shift.astype(jnp.float32).reshape(1, Cout),
                 ((0, 0), (0, Cp - Cout)))                          # (1, Cp)

    # Explicit VMEM limit: double-buffered in/out blocks + resident weights,
    # capped so it also fits v7x's 64 MiB physical VMEM.
    in_b = 2 * (TH + 2) * (W + 2) * Cin * 2
    out_b = 2 * TH * W * Cp * 4
    est = in_b + out_b + 2 * 9 * Cin * Cp * 2 + 2 * Cp * 4 + (2 << 20)
    vmem_limit = int(min(48 << 20, max(2 * est, 16 << 20)))

    kernel = functools.partial(_conv_bn_relu_kernel, TH=TH, W=W, Cin=Cin, Cp=Cp)

    out = pl.pallas_call(
        kernel,
        out_shape=jax.ShapeDtypeStruct((N * nt, TH * W, Cp), jnp.float32),
        grid_spec=pltpu.PrefetchScalarGridSpec(
            num_scalar_prefetch=0,
            grid=(N * nt,),
            in_specs=[
                pl.BlockSpec((1, TH + 2, W + 2, Cin), lambda i: (i, 0, 0, 0)),
                pl.BlockSpec((9, Cin, Cp), lambda i: (0, 0, 0)),
                pl.BlockSpec((1, Cp), lambda i: (0, 0)),
            ],
            out_specs=pl.BlockSpec((1, TH * W, Cp), lambda i: (i, 0, 0)),
        ),
        compiler_params=pltpu.CompilerParams(
            dimension_semantics=("parallel",),
            vmem_limit_bytes=vmem_limit,
        ),
    )(xt, w_taps, sh)

    # TODO(synk): Dropout2d(0.1) training-mode stochastic channel masking is
    # not implemented; eval-mode identity is used here.
    out = out.reshape(N, H, W, Cp)[..., :Cout]
    return jnp.transpose(out, (0, 3, 1, 2)).astype(jnp.float32)    # back to NCHW


def conv_block_reference(x_nchw, params):
    """Pure-JAX f32 reference (eval-mode semantics) for correctness checking."""
    w, b = params["conv_w"], params["conv_b"]
    y = jax.lax.conv_general_dilated(
        x_nchw, w, window_strides=(1, 1), padding=((1, 1), (1, 1)),
        dimension_numbers=("NCHW", "OIHW", "NCHW"))
    y = y + b.reshape(1, -1, 1, 1)
    scale = params["bn_gamma"] / jnp.sqrt(params["bn_var"] + 1e-5)
    shift = params["bn_beta"] - params["bn_mean"] * scale
    y = y * scale.reshape(1, -1, 1, 1) + shift.reshape(1, -1, 1, 1)
    return jnp.maximum(y, 0.0)


if __name__ == "__main__":
    key = jax.random.PRNGKey(0)
    k = jax.random.split(key, 7)
    N, Cin, Cout, H, W = 2, 4, 8, 16, 16

    x = jax.random.normal(k[0], (N, Cin, H, W), jnp.float32)
    fan_in = Cin * 9
    params = {
        "conv_w": jax.random.normal(k[1], (Cout, Cin, 3, 3), jnp.float32)
                  / np.sqrt(fan_in),
        "conv_b": 0.1 * jax.random.normal(k[2], (Cout,), jnp.float32),
        "bn_gamma": 1.0 + 0.1 * jax.random.normal(k[3], (Cout,), jnp.float32),
        "bn_beta": 0.1 * jax.random.normal(k[4], (Cout,), jnp.float32),
        "bn_mean": 0.1 * jax.random.normal(k[5], (Cout,), jnp.float32),
        "bn_var": jnp.abs(jax.random.normal(k[6], (Cout,), jnp.float32)) + 0.5,
    }

    fwd = jax.jit(conv_block_forward)
    out = fwd(x, params)
    out = jax.block_until_ready(out)

    ref = conv_block_reference(x, params)
    # Tolerance loosened vs. a pure-f32 path because activations/weights are
    # fed to the MXU in bf16 (accumulation and epilogue stay f32).
    np.testing.assert_allclose(np.asarray(out), np.asarray(ref),
                               rtol=5e-2, atol=5e-2)
    print("KERNEL_OK")
</pallas_src>

<mosaic_0001>
module attributes {stable_mosaic.version = 11 : i64} {
  func.func @_conv_bn_relu_kernel(%arg0: i32, %arg1: memref<1x18x18x4xbf16, #tpu.memory_space<vmem>>, %arg2: memref<9x4x128xbf16, #tpu.memory_space<vmem>>, %arg3: memref<1x128xf32, #tpu.memory_space<vmem>>, %arg4: memref<1x256x128xf32, #tpu.memory_space<vmem>>) attributes {dimension_semantics = [#tpu.dimension_semantics<parallel>], iteration_bounds = array<i64: 2>, scalar_prefetch = 0 : i64, scratch_operands = 0 : i64, tpu.core_type = #tpu.core_type<tc>, window_params = [{transform_indices = @transform_0, window_bounds = array<i64: 1, 18, 18, 4>}, {pipeline_mode = #tpu.pipeline_mode<synchronous>, transform_indices = @transform_1, window_bounds = array<i64: 9, 4, 128>}, {pipeline_mode = #tpu.pipeline_mode<synchronous>, transform_indices = @transform_2, window_bounds = array<i64: 1, 128>}, {transform_indices = @transform_3, window_bounds = array<i64: 1, 256, 128>}]} {
    %c0 = arith.constant 0 : index
    %c0_0 = arith.constant 0 : index
    %c0_1 = arith.constant 0 : index
    %c0_2 = arith.constant 0 : index
    %0 = vector.load %arg1[%c0, %c0_0, %c0_1, %c0_2] : memref<1x18x18x4xbf16, #tpu.memory_space<vmem>>, vector<1x18x18x4xbf16>
    %1 = vector.shape_cast %0 : vector<1x18x18x4xbf16> to vector<18x18x4xbf16>
    %2 = vector.extract_strided_slice %1 {offsets = [0, 0, 0], sizes = [16, 16, 4], strides = [1, 1, 1]} : vector<18x18x4xbf16> to vector<16x16x4xbf16>
    %3 = vector.shape_cast %2 : vector<16x16x4xbf16> to vector<256x4xbf16>
    %c0_3 = arith.constant 0 : index
    %c0_4 = arith.constant 0 : index
    %c0_5 = arith.constant 0 : index
    %4 = vector.load %arg2[%c0_3, %c0_4, %c0_5] : memref<9x4x128xbf16, #tpu.memory_space<vmem>>, vector<1x4x128xbf16>
    %5 = vector.shape_cast %4 : vector<1x4x128xbf16> to vector<4x128xbf16>
    %cst = arith.constant dense<0.000000e+00> : vector<256x128xf32>
    %6 = tpu.matmul %3, %5, %cst {dimension_numbers = #tpu.dot_dimension_numbers<[1], [0], [0], [1], [0, 0, 1, 1], [], []>} : vector<256x4xbf16>, vector<4x128xbf16>, vector<256x128xf32> -> vector<256x128xf32>
    %7 = vector.extract_strided_slice %1 {offsets = [0, 1, 0], sizes = [16, 16, 4], strides = [1, 1, 1]} : vector<18x18x4xbf16> to vector<16x16x4xbf16>
    %8 = vector.shape_cast %7 : vector<16x16x4xbf16> to vector<256x4xbf16>
    %c1 = arith.constant 1 : index
    %c0_6 = arith.constant 0 : index
    %c0_7 = arith.constant 0 : index
    %9 = vector.load %arg2[%c1, %c0_6, %c0_7] : memref<9x4x128xbf16, #tpu.memory_space<vmem>>, vector<1x4x128xbf16>
    %10 = vector.shape_cast %9 : vector<1x4x128xbf16> to vector<4x128xbf16>
    %cst_8 = arith.constant dense<0.000000e+00> : vector<256x128xf32>
    %11 = tpu.matmul %8, %10, %cst_8 {dimension_numbers = #tpu.dot_dimension_numbers<[1], [0], [0], [1], [0, 0, 1, 1], [], []>} : vector<256x4xbf16>, vector<4x128xbf16>, vector<256x128xf32> -> vector<256x128xf32>
    %12 = arith.addf %6, %11 : vector<256x128xf32>
    %13 = vector.extract_strided_slice %1 {offsets = [0, 2, 0], sizes = [16, 16, 4], strides = [1, 1, 1]} : vector<18x18x4xbf16> to vector<16x16x4xbf16>
    %14 = vector.shape_cast %13 : vector<16x16x4xbf16> to vector<256x4xbf16>
    %c2 = arith.constant 2 : index
    %c0_9 = arith.constant 0 : index
    %c0_10 = arith.constant 0 : index
    %15 = vector.load %arg2[%c2, %c0_9, %c0_10] : memref<9x4x128xbf16, #tpu.memory_space<vmem>>, vector<1x4x128xbf16>
    %16 = vector.shape_cast %15 : vector<1x4x128xbf16> to vector<4x128xbf16>
    %cst_11 = arith.constant dense<0.000000e+00> : vector<256x128xf32>
    %17 = tpu.matmul %14, %16, %cst_11 {dimension_numbers = #tpu.dot_dimension_numbers<[1], [0], [0], [1], [0, 0, 1, 1], [], []>} : vector<256x4xbf16>, vector<4x128xbf16>, vector<256x128xf32> -> vector<256x128xf32>
    %18 = arith.addf %12, %17 : vector<256x128xf32>
    %19 = vector.extract_strided_slice %1 {offsets = [1, 0, 0], sizes = [16, 16, 4], strides = [1, 1, 1]} : vector<18x18x4xbf16> to vector<16x16x4xbf16>
    %20 = vector.shape_cast %19 : vector<16x16x4xbf16> to vector<256x4xbf16>
    %c3 = arith.constant 3 : index
    %c0_12 = arith.constant 0 : index
    %c0_13 = arith.constant 0 : index
    %21 = vector.load %arg2[%c3, %c0_12, %c0_13] : memref<9x4x128xbf16, #tpu.memory_space<vmem>>, vector<1x4x128xbf16>
    %22 = vector.shape_cast %21 : vector<1x4x128xbf16> to vector<4x128xbf16>
    %cst_14 = arith.constant dense<0.000000e+00> : vector<256x128xf32>
    %23 = tpu.matmul %20, %22, %cst_14 {dimension_numbers = #tpu.dot_dimension_numbers<[1], [0], [0], [1], [0, 0, 1, 1], [], []>} : vector<256x4xbf16>, vector<4x128xbf16>, vector<256x128xf32> -> vector<256x128xf32>
    %24 = arith.addf %18, %23 : vector<256x128xf32>
    %25 = vector.extract_strided_slice %1 {offsets = [1, 1, 0], sizes = [16, 16, 4], strides = [1, 1, 1]} : vector<18x18x4xbf16> to vector<16x16x4xbf16>
    %26 = vector.shape_cast %25 : vector<16x16x4xbf16> to vector<256x4xbf16>
    %c4 = arith.constant 4 : index
    %c0_15 = arith.constant 0 : index
    %c0_16 = arith.constant 0 : index
    %27 = vector.load %arg2[%c4, %c0_15, %c0_16] : memref<9x4x128xbf16, #tpu.memory_space<vmem>>, vector<1x4x128xbf16>
    %28 = vector.shape_cast %27 : vector<1x4x128xbf16> to vector<4x128xbf16>
    %cst_17 = arith.constant dense<0.000000e+00> : vector<256x128xf32>
    %29 = tpu.matmul %26, %28, %cst_17 {dimension_numbers = #tpu.dot_dimension_numbers<[1], [0], [0], [1], [0, 0, 1, 1], [], []>} : vector<256x4xbf16>, vector<4x128xbf16>, vector<256x128xf32> -> vector<256x128xf32>
    %30 = arith.addf %24, %29 : vector<256x128xf32>
    %31 = vector.extract_strided_slice %1 {offsets = [1, 2, 0], sizes = [16, 16, 4], strides = [1, 1, 1]} : vector<18x18x4xbf16> to vector<16x16x4xbf16>
    %32 = vector.shape_cast %31 : vector<16x16x4xbf16> to vector<256x4xbf16>
    %c5 = arith.constant 5 : index
    %c0_18 = arith.constant 0 : index
    %c0_19 = arith.constant 0 : index
    %33 = vector.load %arg2[%c5, %c0_18, %c0_19] : memref<9x4x128xbf16, #tpu.memory_space<vmem>>, vector<1x4x128xbf16>
    %34 = vector.shape_cast %33 : vector<1x4x128xbf16> to vector<4x128xbf16>
    %cst_20 = arith.constant dense<0.000000e+00> : vector<256x128xf32>
    %35 = tpu.matmul %32, %34, %cst_20 {dimension_numbers = #tpu.dot_dimension_numbers<[1], [0], [0], [1], [0, 0, 1, 1], [], []>} : vector<256x4xbf16>, vector<4x128xbf16>, vector<256x128xf32> -> vector<256x128xf32>
    %36 = arith.addf %30, %35 : vector<256x128xf32>
    %37 = vector.extract_strided_slice %1 {offsets = [2, 0, 0], sizes = [16, 16, 4], strides = [1, 1, 1]} : vector<18x18x4xbf16> to vector<16x16x4xbf16>
    %38 = vector.shape_cast %37 : vector<16x16x4xbf16> to vector<256x4xbf16>
    %c6 = arith.constant 6 : index
    %c0_21 = arith.constant 0 : index
    %c0_22 = arith.constant 0 : index
    %39 = vector.load %arg2[%c6, %c0_21, %c0_22] : memref<9x4x128xbf16, #tpu.memory_space<vmem>>, vector<1x4x128xbf16>
    %40 = vector.shape_cast %39 : vector<1x4x128xbf16> to vector<4x128xbf16>
    %cst_23 = arith.constant dense<0.000000e+00> : vector<256x128xf32>
    %41 = tpu.matmul %38, %40, %cst_23 {dimension_numbers = #tpu.dot_dimension_numbers<[1], [0], [0], [1], [0, 0, 1, 1], [], []>} : vector<256x4xbf16>, vector<4x128xbf16>, vector<256x128xf32> -> vector<256x128xf32>
    %42 = arith.addf %36, %41 : vector<256x128xf32>
    %43 = vector.extract_strided_slice %1 {offsets = [2, 1, 0], sizes = [16, 16, 4], strides = [1, 1, 1]} : vector<18x18x4xbf16> to vector<16x16x4xbf16>
    %44 = vector.shape_cast %43 : vector<16x16x4xbf16> to vector<256x4xbf16>
    %c7 = arith.constant 7 : index
    %c0_24 = arith.constant 0 : index
    %c0_25 = arith.constant 0 : index
    %45 = vector.load %arg2[%c7, %c0_24, %c0_25] : memref<9x4x128xbf16, #tpu.memory_space<vmem>>, vector<1x4x128xbf16>
    %46 = vector.shape_cast %45 : vector<1x4x128xbf16> to vector<4x128xbf16>
    %cst_26 = arith.constant dense<0.000000e+00> : vector<256x128xf32>
    %47 = tpu.matmul %44, %46, %cst_26 {dimension_numbers = #tpu.dot_dimension_numbers<[1], [0], [0], [1], [0, 0, 1, 1], [], []>} : vector<256x4xbf16>, vector<4x128xbf16>, vector<256x128xf32> -> vector<256x128xf32>
    %48 = arith.addf %42, %47 : vector<256x128xf32>
    %49 = vector.extract_strided_slice %1 {offsets = [2, 2, 0], sizes = [16, 16, 4], strides = [1, 1, 1]} : vector<18x18x4xbf16> to vector<16x16x4xbf16>
    %50 = vector.shape_cast %49 : vector<16x16x4xbf16> to vector<256x4xbf16>
    %c8 = arith.constant 8 : index
    %c0_27 = arith.constant 0 : index
    %c0_28 = arith.constant 0 : index
    %51 = vector.load %arg2[%c8, %c0_27, %c0_28] : memref<9x4x128xbf16, #tpu.memory_space<vmem>>, vector<1x4x128xbf16>
    %52 = vector.shape_cast %51 : vector<1x4x128xbf16> to vector<4x128xbf16>
    %cst_29 = arith.constant dense<0.000000e+00> : vector<256x128xf32>
    %53 = tpu.matmul %50, %52, %cst_29 {dimension_numbers = #tpu.dot_dimension_numbers<[1], [0], [0], [1], [0, 0, 1, 1], [], []>} : vector<256x4xbf16>, vector<4x128xbf16>, vector<256x128xf32> -> vector<256x128xf32>
    %54 = arith.addf %48, %53 : vector<256x128xf32>
    %c0_30 = arith.constant 0 : index
    %c0_31 = arith.constant 0 : index
    %55 = vector.load %arg3[%c0_30, %c0_31] : memref<1x128xf32, #tpu.memory_space<vmem>>, vector<1x128xf32>
    %56 = vector.broadcast %55 : vector<1x128xf32> to vector<256x128xf32>
    %57 = arith.addf %54, %56 : vector<256x128xf32>
    %cst_32 = arith.constant 0.000000e+00 : f32
    %58 = vector.broadcast %cst_32 : f32 to vector<256x128xf32>
    %59 = arith.maximumf %57, %58 : vector<256x128xf32>
    %c0_33 = arith.constant 0 : index
    %c0_34 = arith.constant 0 : index
    %c0_35 = arith.constant 0 : index
    %60 = vector.load %arg4[%c0_33, %c0_34, %c0_35] : memref<1x256x128xf32, #tpu.memory_space<vmem>>, vector<1x256x128xf32>
    %61 = vector.shape_cast %60 : vector<1x256x128xf32> to vector<256x128xf32>
    %62 = vector.shape_cast %59 : vector<256x128xf32> to vector<1x256x128xf32>
    tpu.vector_store %arg4[%c0_33, %c0_34, %c0_35], %62 {strides = array<i32>} : memref<1x256x128xf32, #tpu.memory_space<vmem>>, vector<1x256x128xf32>,
    return
  }
  func.func @transform_0(%arg0: i32) -> (i32, i32, i32, i32) {
    %c0_i32 = arith.constant 0 : i32
    %c0_i32_0 = arith.constant 0 : i32
    %c0_i32_1 = arith.constant 0 : i32
    %c0_i32_2 = arith.constant 0 : i32
    return %arg0, %c0_i32, %c0_i32_0, %c0_i32_1 : i32, i32, i32, i32
  }
  func.func @transform_1(%arg0: i32) -> (i32, i32, i32) {
    %c0_i32 = arith.constant 0 : i32
    %c0_i32_0 = arith.constant 0 : i32
    %c0_i32_1 = arith.constant 0 : i32
    %c0_i32_2 = arith.constant 0 : i32
    return %c0_i32, %c0_i32_0, %c0_i32_1 : i32, i32, i32
  }
  func.func @transform_2(%arg0: i32) -> (i32, i32) {
    %c0_i32 = arith.constant 0 : i32
    %c0_i32_0 = arith.constant 0 : i32
    %c0_i32_1 = arith.constant 0 : i32
    return %c0_i32, %c0_i32_0 : i32, i32
  }
  func.func @transform_3(%arg0: i32) -> (i32, i32, i32) {
    %c0_i32 = arith.constant 0 : i32
    %c0_i32_0 = arith.constant 0 : i32
    %c0_i32_1 = arith.constant 0 : i32
    return %arg0, %c0_i32, %c0_i32_0 : i32, i32, i32
  }
}

</mosaic_0001>

<bundles_post_ra>
// kernel: conv_block_forward.1
= control target key start
LH: loop header
LB: loop body
LE: loop exit
PB: predicated region body
PF: predicated region fallthrough
CT: control target
= control target key end

     0   :  { %s4067_s12 = smov 0   ;;  %s5120_s0 = inlined_call_operand.vmem [shape: bf16[2,18,18,4], index: 0, kind: input, shape index: {}]   ;;  %s5121_s1 = inlined_call_operand.vmem [shape: bf16[9,4,128], index: 1, kind: input, shape index: {}]   ;;  %s5122_s2 = inlined_call_operand.vmem [shape: f32[1,128], index: 2, kind: input, shape index: {}]   ;;  %s5123_s3 = inlined_call_operand.vmem [shape: f32[2,256,128], index: 3, kind: output, shape index: {}]  }
   0x1 LB: > { %s3045_s13 = sadd.s32 4294967295, %s4045_s12   ;;  %p3049_p0 = scmp.ge.s32.totalorder %s4045_s12, 1  ;;  %s4045_s12 = sphi %s4067_s12, %s13_s12  }
   0x2   : > { %p137_p1 = scmp.lt.s32.totalorder %s4045_s12, 3 }
   0x4   : > { %p138_p2 = pnand %p3049_p0, %p137_p1 }
   0x6   : > { %141 = sbr.rel (%p138_p2) target bundleno = 553 (0x229), region = 32 }
   0xd   : > { %v3053_v0 = vld [vmem:[%s5121_s1 + $0x2] sm:$0x3]  ;;  %vm713_vm0 = vcmask 1041408   ;;  %v3185_v1 = vld [vmem:[%s5121_s1 + $0x8] sm:$0x3]  ;;  %p161_p3 = scmp.lt.s32.totalorder %s3045_s13, 1 }
   0xe   : > { %3998 = vmatprep.subr.msk.bf16.mxu1 %vm713_vm0, %v3053_v0  ;;  %4002 = vmatprep.subr.msk.bf16.mxu0 %vm713_vm0, %v3185_v1  ;;  %v715_v2 = vsel %vm713_vm0, %v3053_v0, 0  ;;  %v4085_v3 = vsel %vm713_vm0, %v3185_v1, 0  ;;  %v226_v4 = vld [vmem:[%s5121_s1] sm:$0x3]  ;;  %v3204_v5 = vld [vmem:[%s5121_s1 + $0xa] sm:$0x3] }
   0xf   : > { %5155 = vst [vmem:[#allocation2_spill] sm:$0xff] %v4085_v3  ;;  %3435 = vmatpush3.bf16.msra.mxu1 %v715_v2  ;;  %3571 = vmatpush3.bf16.msra.mxu0 %v4085_v3  ;;  %s5202_s13 = smov (!%p161_p3, %s3045_s13), 1  ;;  %vm227_vm1 = vsmask.f32 3328  ;;  %vm228_vm2 = vsmask.f32 7440 }
  0x10   : > { %3999 = vmatprep.subr.msk.bf16.mxu1 %vm713_vm0, %v226_v4  ;;  %4004 = vmatprep.subr.msk.bf16.mxu0 %vm713_vm0, %v3204_v5  ;;  %s4008_s22 = smul.u32 216, %s5202_s13  ;;  %v4105_v6 = vsel %vm713_vm0, %v226_v4, 0  ;;  %v4108_v7 = vsel %vm713_vm0, %v3204_v5, 0  ;;  %v4113_v8 = vld [vmem:[%s5121_s1 + $0xc] sm:$0x3]  ;;  %vm664_vm3 = vcmask 31744   ;;  %vm4149_vm4 = vmor %vm227_vm1, %vm228_vm2 }
  0x11   : > { %v4137_v20 = vsel %vm713_vm0, %v4113_v8, 0  ;;  %vm1186_vm5 = vcmask 1042432   ;;  %vm1187_vm6 = vcmask 1046532   ;;  %s3280_s15 = sshll.u32 %s5202_s13, 8 }
  0x12   : > { %s4102_s25 = scalar_lea.vmem %s5120_s0, %s4008_s22  ;;  %vm4330_vm7 = vmor %vm1186_vm5, %vm1187_vm6  ;;  %s5048_s18 = scalar_lea.vmem %s5123_s3, %s3280_s15 }
  0x13   : > { %v4116_v9 = vld [vmem:[%s4102_s25] sm:$0xf]  ;;  %v4119_v10 = vld [vmem:[%s4102_s25 + $0x4] sm:$0xf]  ;;  %v174_v11 = vld [vmem:[%s4102_s25 + $0x8] sm:$0x1] }
  0x14   : > { %v231_v12 = vshrl.u32 %v4116_v9, 16  ;;  %v234_v13 = vshll.u32 %v4116_v9, 16  ;;  %v240_v14 = vshll.u32 %v4119_v10, 16  ;;  %v244_v15 = vshrl.u32 %v4119_v10, 16  ;;  %v4127_v16 = vld [vmem:[%s4102_s25 + $0xc] sm:$0xf] }
  0x15   : > { %v250_v17 = vshll.u32 %v174_v11, 16  ;;  %v4130_v18 = vld [vmem:[%s4102_s25 + $0x10] sm:$0xf]  ;;  %v4133_v19 = vld [vmem:[%s4102_s25 + $0x14] sm:$0x1]  ;;  %v255_v26 = vshrl.u32 %v4127_v16, 16 }
  0x16   : > { %v233_v21 = vrot.slane %v231_v12, 4  ;;  %v236_v22 = vrot.slane %v234_v13, 5  ;;  %v242_v23 = vrot.slane %v240_v14, 5  ;;  %v246_v24 = vrot.slane %v244_v15, 4  ;;  %v4145_v33 = vld [vmem:[%s4102_s25 + $0x18] sm:$0xf] }
  0x17   : > { %v252_v25 = vrot.slane %v250_v17, 5  ;;  %v258_v27 = vshll.u32 %v4127_v16, 16  ;;  %v264_v28 = vshll.u32 %v4130_v18, 16  ;;  %v268_v31 = vshrl.u32 %v4130_v18, 16  ;;  %v4158_v39 = vld [vmem:[%s4102_s25 + $0x1c] sm:$0xf] }
  0x18   : > { %v237_v29 = vor.u32 %v236_v22, %v233_v21  ;;  %v247_v30 = vor.u32 %v246_v24, %v242_v23  ;;  %v274_v32 = vshll.u32 %v4133_v19, 16  ;;  %v257_v35 = vrot.slane %v255_v26, 4  ;;  %v4162_v46 = vld [vmem:[%s4102_s25 + $0x20] sm:$0x1]  ;;  %v4172_v57 = vld [vmem:[%s4102_s25 + $0x24] sm:$0xf] }
  0x19   : > { %v260_v36 = vrot.slane %v258_v27, 5  ;;  %v266_v37 = vrot.slane %v264_v28, 5  ;;  %v4155_v38 = vcombine.low %v4127_v16, %v4130_v18  ;;  %v270_v42 = vrot.slane %v268_v31, 4  ;;  %v4177_v62 = vld [vmem:[%s4102_s25 + $0x28] sm:$0xf] }
  0x1a   : > { %v238_v40 = vrot.slane %v237_v29, 4  ;;  %v248_v41 = vrot.slane %v247_v30, 4  ;;  %v276_v43 = vrot.slane %v274_v32, 5  ;;  %v1201_v45 = vrot.slane %v4133_v19, 5  ;;  %v4185_v4 = vld [vmem:[%s4102_s25 + $0x2c] sm:$0x1] }
  0x1b   : > { %v261_v44 = vor.u32 %v260_v36, %v257_v35  ;;  %v279_v47 = vshrl.u32 %v4145_v33, 16  ;;  %v282_v48 = vshll.u32 %v4145_v33, 16  ;;  %v271_v51 = vor.u32 %v270_v42, %v266_v37  ;;  %v4191_v14 = vld [vmem:[%s4102_s25 + $0x30] sm:$0xf]  ;;  %v4203_v28 = vld [vmem:[%s4102_s25 + $0x34] sm:$0xf] }
  0x1c   : > { %v243_v49 = vsel %vm4149_vm4, %v238_v40, %v242_v23  ;;  %v253_v50 = vsel %vm4149_vm4, %v248_v41, %v252_v25  ;;  %v288_v52 = vshll.u32 %v4158_v39, 16  ;;  %v292_v60 = vshrl.u32 %v4158_v39, 16  ;;  %v4198_v23 = vld [vmem:[%s5121_s1 + $0x4] sm:$0x3]  ;;  %v4210_v32 = vld [vmem:[%s4102_s25 + $0x38] sm:$0x1] }
  0x1d   : > { %v3054_v53 = vcombine.low %v243_v49, %v253_v50  ;;  %v262_v54 = vrot.slane %v261_v44, 4  ;;  %v281_v55 = vrot.slane %v279_v47, 4  ;;  %v284_v56 = vrot.slane %v282_v48, 5  ;;  %v4218_v48 = vld [vmem:[%s4102_s25 + $0x3c] sm:$0xf] }
  0x1e   : > { %v272_v58 = vrot.slane %v271_v51, 4  ;;  %v290_v59 = vrot.slane %v288_v52, 5  ;;  %v298_v61 = vshll.u32 %v4162_v46, 16  ;;  %v1205_v1 = vrot.slane %v4158_v39, 5  ;;  %v4226_v52 = vld [vmem:[%s4102_s25 + $0x40] sm:$0xf] }
  0x1f   : > { %3436 = vmatprep.mubr.msk.bf16.mxu1 %vm664_vm3, %v3054_v53  ;;  %v267_v63 = vsel %vm4149_vm4, %v262_v54, %v266_v37  ;;  %v285_v0 = vor.u32 %v284_v56, %v281_v55  ;;  %v1208_v2 = vrot.slane %v4162_v46, 5  ;;  %v294_v11 = vrot.slane %v292_v60, 4 }
  0x20   : > { %v277_v5 = vsel %vm4149_vm4, %v272_v58, %v276_v43  ;;  %v300_v12 = vrot.slane %v298_v61, 5  ;;  %v303_v13 = vshrl.u32 %v4172_v57, 16  ;;  %v306_v21 = vshll.u32 %v4172_v57, 16 }
  0x21   : > { %v3055_v15 = vcombine.low %v267_v63, %v277_v5  ;;  %v286_v17 = vrot.slane %v285_v0, 4  ;;  %v312_v22 = vshll.u32 %v4177_v62, 16  ;;  %v295_v24 = vor.u32 %v294_v11, %v290_v59  ;;  %v4238_v5 = vld [vmem:[%s4102_s25 + $0x44] sm:$0x1] }
  0x22   : > { %v305_v25 = vrot.slane %v303_v13, 4  ;;  %v316_v26 = vshrl.u32 %v4177_v62, 16  ;;  %v322_v27 = vshll.u32 %v4185_v4, 16  ;;  %v308_v30 = vrot.slane %v306_v21, 5  ;;  %v4243_v13 = vld [vmem:[%s4102_s25 + $0x48] sm:$0xf] }
  0x23   : > { %3572 = vmatprep.mubr.msk.bf16.mxu0 %vm664_vm3, %v3055_v15  ;;  %3437 = vmatmul.mubr.msk.bf16.vlgmr.msra.gmra.mrb[0].mxu1 %vm664_vm3, %v3055_v15  ;;  %v291_v29 = vsel %vm4149_vm4, %v286_v17, %v290_v59  ;;  %v314_v31 = vrot.slane %v312_v22, 5  ;;  %v327_v35 = vshrl.u32 %v4191_v14, 16  ;;  %v296_v36 = vrot.slane %v295_v24, 4  ;;  %v4250_v24 = vld [vmem:[%s4102_s25 + $0x4c] sm:$0xf] }
  0x24   : > { %3469 = vmatpush3.bf16.msra.mxu1 %v4105_v6  ;;  %v318_v37 = vrot.slane %v316_v26, 4  ;;  %v324_v40 = vrot.slane %v322_v27, 5  ;;  %v330_v41 = vshll.u32 %v4191_v14, 16  ;;  %v309_v42 = vor.u32 %v308_v30, %v305_v25 }
  0x25   : > { %v329_v43 = vrot.slane %v327_v35, 4  ;;  %v336_v44 = vshll.u32 %v4203_v28, 16  ;;  %v340_v47 = vshrl.u32 %v4203_v28, 16  ;;  %4000 = vmatprep.subr.msk.bf16.mxu1 %vm713_vm0, %v4198_v23  ;;  %v301_v49 = vsel %vm4149_vm4, %v296_v36, %v300_v12 }
  0x26   : > { %v319_v6 = vor.u32 %v318_v37, %v314_v31  ;;  %v332_v50 = vrot.slane %v330_v41, 5  ;;  %v346_v51 = vshll.u32 %v4210_v32, 16  ;;  %v4228_v53 = vcombine.low %v291_v29, %v301_v49 }
  0x27   : > { %v310_v54 = vrot.slane %v309_v42, 4  ;;  %v338_v55 = vrot.slane %v336_v44, 5  ;;  %v342_v56 = vrot.slane %v340_v47, 4  ;;  %v351_v61 = vshrl.u32 %v4218_v48, 16  ;;  %v4272_v42 = vld [vmem:[%s4102_s25 + $0x54] sm:$0xf] }
  0x28   : > { %5158 = vst [vmem:[#allocation3_spill] sm:$0xff] %v4228_v53  ;;  %v320_v58 = vrot.slane %v319_v6, 4  ;;  %v333_v59 = vor.u32 %v332_v50, %v329_v43  ;;  %v348_v60 = vrot.slane %v346_v51, 5  ;;  %3573 = vmatmul.mubr.msk.bf16.vlgmr.msra.gmra.mrb[0].mxu0 %vm664_vm3, %v4228_v53  ;;  %3440 = vmatprep.mubr.msk.bf16.mxu1 %vm664_vm3, %v4228_v53  ;;  %v354_v11 = vshll.u32 %v4218_v48, 16  ;;  %5160 = vst [vmem:[#allocation5_spill] sm:$0xff] %v4272_v42 }
  0x29   : > { %v315_v63 = vsel %vm4149_vm4, %v310_v54, %v314_v31  ;;  %v343_v0 = vor.u32 %v342_v56, %v338_v55  ;;  %v360_v12 = vshll.u32 %v4226_v52, 16  ;;  %3605 = vmatpush3.bf16.msra.mxu0 %v4108_v7  ;;  %v353_v21 = vrot.slane %v351_v61, 4  ;;  %v4277_v6 = vld [vmem:[%s4102_s25 + $0x58] sm:$0xf] }
  0x2a   : > { %v325_v15 = vsel %vm4149_vm4, %v320_v58, %v324_v40  ;;  %v334_v17 = vrot.slane %v333_v59, 4  ;;  %v364_v22 = vshrl.u32 %v4226_v52, 16  ;;  %v356_v27 = vrot.slane %v354_v11, 5  ;;  %4005 = vmatprep.subr.msk.bf16.mxu0 %vm713_vm0, %v4113_v8  ;;  %v4267_v8 = vld [vmem:[%s4102_s25 + $0x50] sm:$0x1] }
  0x2b   : > { %v4252_v25 = vcombine.low %v315_v63, %v325_v15  ;;  %v344_v26 = vrot.slane %v343_v0, 4  ;;  %v362_v29 = vrot.slane %v360_v12, 5  ;;  %v370_v31 = vshll.u32 %v4238_v5, 16  ;;  %v4290_v11 = vld [vmem:[%s4102_s25 + $0x5c] sm:$0x1] }
  0x2c   : > { %v339_v7 = vsel %vm4149_vm4, %v334_v17, %v338_v55  ;;  %v366_v30 = vrot.slane %v364_v22, 4  ;;  %v375_v35 = vshrl.u32 %v4243_v13, 16  ;;  %v357_v37 = vor.u32 %v356_v27, %v353_v21  ;;  %v4294_v15 = vld [vmem:[%s4102_s25 + $0x60] sm:$0xf]  ;;  %v4299_v27 = vld [vmem:[%s4102_s25 + $0x64] sm:$0xf] }
  0x2d   : > { %5159 = vst [vmem:[#allocation4_spill] sm:$0xff] %v4252_v25  ;;  %3576 = vmatprep.mubr.msk.bf16.mxu0 %vm664_vm3, %v4252_v25  ;;  %3441 = vmatmul.mubr.msk.bf16.gmra.mrb[4].mxu1 %vm664_vm3, %v4252_v25  ;;  %v349_v36 = vsel %vm4149_vm4, %v344_v26, %v348_v60  ;;  %v378_v40 = vshll.u32 %v4243_v13, 16  ;;  %v384_v41 = vshll.u32 %v4250_v24, 16  ;;  %v372_v47 = vrot.slane %v370_v31, 5  ;;  %v4511_v25 = vld [vmem:[%s4102_s25 + $0xa8] sm:$0xf] }
  0x2e   : > { %v4274_v43 = vcombine.low %v339_v7, %v349_v36  ;;  %v367_v44 = vor.u32 %v366_v30, %v362_v29  ;;  %v377_v49 = vrot.slane %v375_v35, 4  ;;  %v358_v50 = vrot.slane %v357_v37, 4 }
  0x2f   : > { %v380_v51 = vrot.slane %v378_v40, 5  ;;  %v386_v54 = vrot.slane %v384_v41, 5  ;;  %v388_v55 = vshrl.u32 %v4250_v24, 16  ;;  %v394_v58 = vshll.u32 %v4267_v8, 16 }
  0x30   : > { %5161 = vst [vmem:[#allocation6_spill] sm:$0xff] %v4274_v43  ;;  %3444 = vmatprep.mubr.msk.bf16.mxu1 %vm664_vm3, %v4274_v43  ;;  %v368_v56 = vrot.slane %v367_v44, 4  ;;  %v399_v59 = vshrl.u32 %v4272_v42, 16  ;;  %v402_v60 = vshll.u32 %v4272_v42, 16  ;;  %3577 = vmatmul.mubr.msk.bf16.gmra.mrb[4].mxu0 %vm664_vm3, %v4274_v43  ;;  %v363_v61 = vsel %vm4149_vm4, %v358_v50, %v362_v29 }
  0x31   : > { %v381_v63 = vor.u32 %v380_v51, %v377_v49  ;;  %v390_v0 = vrot.slane %v388_v55, 4  ;;  %v408_v12 = vshll.u32 %v4277_v6, 16  ;;  %v396_v21 = vrot.slane %v394_v58, 5 }
  0x32   : > { %v373_v17 = vsel %vm4149_vm4, %v368_v56, %v372_v47  ;;  %v401_v22 = vrot.slane %v399_v59, 4  ;;  %v404_v26 = vrot.slane %v402_v60, 5  ;;  %v412_v36 = vshrl.u32 %v4277_v6, 16  ;;  %v4313_v47 = vld [vmem:[%s4102_s25 + $0x68] sm:$0x1] }
  0x33   : > { %v4301_v7 = vcombine.low %v363_v61, %v373_v17  ;;  %v382_v29 = vrot.slane %v381_v63, 4  ;;  %v391_v30 = vor.u32 %v390_v0, %v386_v54  ;;  %v410_v31 = vrot.slane %v408_v12, 5 }
  0x34   : > { %v405_v35 = vor.u32 %v404_v26, %v401_v22  ;;  %v418_v37 = vshll.u32 %v4290_v11, 16  ;;  %v423_v40 = vshrl.u32 %v4294_v15, 16  ;;  %v426_v49 = vshll.u32 %v4294_v15, 16 }
  0x35   : > { %5162 = vst [vmem:[#allocation7_spill] sm:$0xff] %v4301_v7  ;;  %3580 = vmatprep.mubr.msk.bf16.mxu0 %vm664_vm3, %v4301_v7  ;;  %3445 = vmatmul.mubr.msk.bf16.gmra.mrb[8].mxu1 %vm664_vm3, %v4301_v7  ;;  %v387_v41 = vsel %vm4149_vm4, %v382_v29, %v386_v54  ;;  %v392_v44 = vrot.slane %v391_v30, 4  ;;  %v432_v50 = vshll.u32 %v4299_v27, 16  ;;  %v414_v55 = vrot.slane %v412_v36, 4  ;;  %v4321_v54 = vld [vmem:[%s4102_s25 + $0x6c] sm:$0xf] }
  0x36   : > { %v406_v51 = vrot.slane %v405_v35, 4  ;;  %v420_v56 = vrot.slane %v418_v37, 5  ;;  %v425_v58 = vrot.slane %v423_v40, 4  ;;  %v428_v60 = vrot.slane %v426_v49, 5  ;;  %v4337_v36 = vld [vmem:[%s4102_s25 + $0x70] sm:$0xf] }
  0x37   : > { %v397_v59 = vsel %vm4149_vm4, %v392_v44, %v396_v21  ;;  %v434_v61 = vrot.slane %v432_v50, 5  ;;  %v436_v63 = vshrl.u32 %v4299_v27, 16  ;;  %v415_v17 = vor.u32 %v414_v55, %v410_v31  ;;  %v4488_v7 = vld [vmem:[%s4102_s25 + $0xa0] sm:$0xf] }
  0x38   : > { %v4323_v0 = vcombine.low %v387_v41, %v397_v59  ;;  %v411_v12 = vsel %vm4149_vm4, %v406_v51, %v410_v31  ;;  %v442_v22 = vshll.u32 %v4313_v47, 16  ;;  %v429_v21 = vor.u32 %v428_v60, %v425_v58  ;;  %v4350_v51 = vld [vmem:[%s4102_s25 + $0x74] sm:$0x1] }
  0x39   : > { %v438_v29 = vrot.slane %v436_v63, 4  ;;  %v3119_v30 = vrot.slane %v4127_v16, 9  ;;  %v1198_v35 = vrot.slane %v4130_v18, 5  ;;  %v416_v31 = vrot.slane %v415_v17, 4 }
  0x3a   : > { %5163 = vst [vmem:[#allocation8_spill] sm:$0xff] %v4323_v0  ;;  %3581 = vmatmul.mubr.msk.bf16.gmra.mrb[8].mxu0 %vm664_vm3, %v4323_v0  ;;  %3448 = vmatprep.mubr.msk.bf16.mxu1 %vm664_vm3, %v4323_v0  ;;  %v444_v37 = vrot.slane %v442_v22, 5  ;;  %v447_v40 = vshrl.u32 %v4321_v54, 16  ;;  %v450_v41 = vshll.u32 %v4321_v54, 16  ;;  %v430_v44 = vrot.slane %v429_v21, 4 }
  0x3b   : > { %v439_v49 = vor.u32 %v438_v29, %v434_v61  ;;  %v1199_v16 = vsel %vm4330_vm7, %v3119_v30, %v1198_v35  ;;  %v1200_v18 = vrot.slane %v1198_v35, 4  ;;  %v421_v50 = vsel %vm4149_vm4, %v416_v31, %v420_v56  ;;  %v4362_v56 = vld [vmem:[%s4102_s25 + $0x78] sm:$0xf]  ;;  %v4378_v31 = vld [vmem:[%s4102_s25 + $0x7c] sm:$0xf] }
  0x3c   : > { %v449_v55 = vrot.slane %v447_v40, 4  ;;  %v452_v58 = vrot.slane %v450_v41, 5  ;;  %v456_v59 = vshll.u32 %v4337_v36, 16  ;;  %v4353_v60 = vcombine.low %v411_v12, %v421_v50 }
  0x3d   : > { %v435_v63 = vsel %vm4149_vm4, %v430_v44, %v434_v61  ;;  %v440_v17 = vrot.slane %v439_v49, 4  ;;  %v1202_v22 = vsel %vm4330_vm7, %v1200_v18, %v1201_v45  ;;  %v460_v35 = vshrl.u32 %v4337_v36, 16  ;;  %v4383_v49 = vld [vmem:[%s4102_s25 + $0x80] sm:$0x1] }
  0x3e   : > { %5166 = vst [vmem:[#allocation9_spill] sm:$0xff] %v4353_v60  ;;  %v4364_v21 = vcombine.low %v1199_v16, %v1202_v22  ;;  %v453_v29 = vor.u32 %v452_v58, %v449_v55  ;;  %v458_v30 = vrot.slane %v456_v59, 5  ;;  %3584 = vmatprep.mubr.msk.bf16.mxu0 %vm664_vm3, %v4353_v60  ;;  %3449 = vmatmul.mubr.msk.bf16.gmra.mrb[12].mxu1 %vm664_vm3, %v4353_v60  ;;  %v466_v45 = vshll.u32 %v4350_v51, 16  ;;  %v4481_v60 = vld [vmem:[%s4102_s25 + $0x9c] sm:$0xf] }
  0x3f   : > { %v445_v19 = vsel %vm4149_vm4, %v440_v17, %v444_v37  ;;  %v3120_v61 = vrot.slane %v4145_v33, 9  ;;  %v1207_v12 = vrot.slane %v1205_v1, 4  ;;  %v462_v44 = vrot.slane %v460_v35, 4 }
  0x40   : > { %5167 = vst [vmem:[#allocation10_spill] sm:$0xff] %v4364_v21  ;;  %v4380_v40 = vcombine.low %v435_v63, %v445_v19  ;;  %v454_v41 = vrot.slane %v453_v29, 4  ;;  %v471_v16 = vshrl.u32 %v4362_v56, 16  ;;  %v468_v18 = vrot.slane %v466_v45, 5  ;;  %v4409_v29 = vld [vmem:[%s4102_s25 + $0x84] sm:$0xf] }
  0x41   : > { %v1206_v37 = vsel %vm4330_vm7, %v3120_v61, %v1205_v1  ;;  %v1209_v50 = vsel %vm4330_vm7, %v1207_v12, %v1208_v2  ;;  %v474_v55 = vshll.u32 %v4362_v56, 16  ;;  %v463_v59 = vor.u32 %v462_v44, %v458_v30 }
  0x42   : > { %5168 = vst [vmem:[#allocation11_spill] sm:$0xff] %v4380_v40  ;;  %3585 = vmatmul.mubr.msk.bf16.gmra.mrb[12].mxu0 %vm664_vm3, %v4380_v40  ;;  %3452 = vmatprep.mubr.msk.bf16.mxu1 %vm664_vm3, %v4380_v40  ;;  %v459_v58 = vsel %vm4149_vm4, %v454_v41, %v458_v30  ;;  %v4401_v63 = vcombine.low %v1206_v37, %v1209_v50  ;;  %v473_v1 = vrot.slane %v471_v16, 4  ;;  %v480_v2 = vshll.u32 %v4378_v31, 16  ;;  %v4415_v16 = vld [vmem:[%s4102_s25 + $0x88] sm:$0xf] }
  0x43   : > { %3606 = vmatprep.mubr.msk.bf16.mxu0 %vm664_vm3, %v4364_v21  ;;  %v476_v46 = vrot.slane %v474_v55, 5  ;;  %v484_v17 = vshrl.u32 %v4378_v31, 16  ;;  %v490_v22 = vshll.u32 %v4383_v49, 16  ;;  %v464_v35 = vrot.slane %v463_v59, 4 }
  0x44   : > { %5169 = vst [vmem:[#allocation12_spill] sm:$0xff] %v4401_v63  ;;  %v3121_v30 = vrot.slane %v4172_v57, 9  ;;  %v1212_v19 = vrot.slane %v4177_v62, 5  ;;  %v1215_v45 = vrot.slane %v4185_v4, 5  ;;  %v482_v12 = vrot.slane %v480_v2, 5 }
  0x45   : > { %v477_v61 = vor.u32 %v476_v46, %v473_v1  ;;  %v486_v41 = vrot.slane %v484_v17, 4  ;;  %v492_v44 = vrot.slane %v490_v22, 5  ;;  %v469_v37 = vsel %vm4149_vm4, %v464_v35, %v468_v18  ;;  %v4425_v1 = vld [vmem:[%s4102_s25 + $0x8c] sm:$0x1] }
  0x46   : > { %v1213_v50 = vsel %vm4330_vm7, %v3121_v30, %v1212_v19  ;;  %v1214_v55 = vrot.slane %v1212_v19, 4  ;;  %v495_v59 = vshrl.u32 %v4409_v29, 16  ;;  %v4422_v3 = vcombine.low %v459_v58, %v469_v37 }
  0x47   : > { %v478_v40 = vrot.slane %v477_v61, 4  ;;  %v487_v4 = vor.u32 %v486_v41, %v482_v12  ;;  %v498_v46 = vshll.u32 %v4409_v29, 16  ;;  %v504_v18 = vshll.u32 %v4415_v16, 16  ;;  %v4439_v61 = vld [vmem:[%s4102_s25 + $0x90] sm:$0xf] }
  0x48   : > { %5170 = vst [vmem:[#allocation13_spill] sm:$0xff] %v4422_v3  ;;  %v1216_v2 = vsel %vm4330_vm7, %v1214_v55, %v1215_v45  ;;  %v497_v17 = vrot.slane %v495_v59, 4  ;;  %v508_v22 = vshrl.u32 %v4415_v16, 16  ;;  %3453 = vmatmul.mubr.msk.bf16.gmra.mrb[16].mxu1 %vm664_vm3, %v4422_v3  ;;  %v4444_v45 = vld [vmem:[%s5121_s1 + $0xe] sm:$0x3]  ;;  %v1219_v59 = vrot.slane %v4203_v28, 5 }
  0x49   : > { %v483_v58 = vsel %vm4149_vm4, %v478_v40, %v482_v12  ;;  %v488_v35 = vrot.slane %v487_v4, 4  ;;  %v4436_v30 = vcombine.low %v1213_v50, %v1216_v2  ;;  %v500_v19 = vrot.slane %v498_v46, 5  ;;  %5172 = vst [vmem:[#allocation15_spill] sm:$0xff] %v4444_v45  ;;  %v4458_v46 = vld [vmem:[%s4102_s25 + $0x94] sm:$0xf] }
  0x4a   : > { %3607 = vmatmul.mubr.msk.bf16.vlgmr.msra.gmra.mrb[0].mxu0 %vm664_vm3, %v4401_v63  ;;  %v506_v41 = vrot.slane %v504_v18, 5  ;;  %v510_v37 = vrot.slane %v508_v22, 4  ;;  %v514_v40 = vshll.u32 %v4425_v1, 16  ;;  %v3122_v12 = vrot.slane %v4191_v14, 9  ;;  %v4463_v3 = vld [vmem:[%s4102_s25 + $0x98] sm:$0x1] }
  0x4b   : > { %5171 = vst [vmem:[#allocation14_spill] sm:$0xff] %v4436_v30  ;;  %3639 = vmatpush3.bf16.msra.mxu0 %v4137_v20  ;;  %v493_v50 = vsel %vm4149_vm4, %v488_v35, %v492_v44  ;;  %3610 = vmatprep.mubr.msk.bf16.mxu0 %vm664_vm3, %v4436_v30  ;;  %v501_v55 = vor.u32 %v500_v19, %v497_v17  ;;  %v1222_v4 = vrot.slane %v4210_v32, 5  ;;  %v519_v20 = vshrl.u32 %v4439_v61, 16 }
  0x4c   : > { %v4460_v2 = vcombine.low %v483_v58, %v493_v50  ;;  %v511_v18 = vor.u32 %v510_v37, %v506_v41  ;;  %v516_v22 = vrot.slane %v514_v40, 5  ;;  %4006 = vmatprep.subr.msk.bf16.mxu0 %vm713_vm0, %v4444_v45  ;;  %v1220_v17 = vsel %vm4330_vm7, %v3122_v12, %v1219_v59 }
  0x4d   : > { %v502_v44 = vrot.slane %v501_v55, 4  ;;  %v1221_v35 = vrot.slane %v1219_v59, 4  ;;  %v522_v32 = vshll.u32 %v4439_v61, 16  ;;  %v521_v19 = vrot.slane %v519_v20, 4 }
  0x4e   : > { %5173 = vst [vmem:[#allocation16_spill] sm:$0xff] %v4460_v2  ;;  %3456 = vmatprep.mubr.msk.bf16.mxu1 %vm664_vm3, %v4460_v2  ;;  %v512_v58 = vrot.slane %v511_v18, 4  ;;  %v528_v37 = vshll.u32 %v4458_v46, 16  ;;  %v532_v40 = vshrl.u32 %v4458_v46, 16  ;;  %v538_v59 = vshll.u32 %v4463_v3, 16 }
  0x4f   : > { %v507_v50 = vsel %vm4149_vm4, %v502_v44, %v506_v41  ;;  %v1223_v55 = vsel %vm4330_vm7, %v1221_v35, %v1222_v4  ;;  %v524_v12 = vrot.slane %v522_v32, 5  ;;  %v3123_v4 = vrot.slane %v4218_v48, 9 }
  0x50   : > { %v517_v2 = vsel %vm4149_vm4, %v512_v58, %v516_v22  ;;  %v4485_v18 = vcombine.low %v1220_v17, %v1223_v55  ;;  %v530_v20 = vrot.slane %v528_v37, 5  ;;  %v534_v0 = vrot.slane %v532_v40, 4  ;;  %v4501_v58 = vld [vmem:[%s4102_s25 + $0xa4] sm:$0x1] }
  0x51   : > { %v4490_v43 = vcombine.low %v507_v50, %v517_v2  ;;  %v525_v41 = vor.u32 %v524_v12, %v521_v19  ;;  %v540_v44 = vrot.slane %v538_v59, 5  ;;  %v1226_v32 = vrot.slane %v4226_v52, 5 }
  0x52   : > { %5174 = vst [vmem:[#allocation17_spill] sm:$0xff] %v4485_v18  ;;  %3611 = vmatmul.mubr.msk.bf16.gmra.mrb[4].mxu0 %vm664_vm3, %v4485_v18  ;;  %v535_v35 = vor.u32 %v534_v0, %v530_v20  ;;  %v1229_v22 = vrot.slane %v4238_v5, 5  ;;  %v543_v17 = vshrl.u32 %v4481_v60, 16  ;;  %v546_v19 = vshll.u32 %v4481_v60, 16 }
  0x53   : > { %5175 = vst [vmem:[#allocation18_spill] sm:$0xff] %v4490_v43  ;;  %3457 = vmatmul.mubr.msk.bf16.gmra.mrb[20].mxu1 %vm664_vm3, %v4490_v43  ;;  %v526_v2 = vrot.slane %v525_v41, 4  ;;  %v552_v37 = vshll.u32 %v4488_v7, 16  ;;  %v556_v0 = vshrl.u32 %v4488_v7, 16  ;;  %v1227_v5 = vsel %vm4330_vm7, %v3123_v4, %v1226_v32 }
  0x54   : > { %v536_v40 = vrot.slane %v535_v35, 4  ;;  %v1228_v50 = vrot.slane %v1226_v32, 4  ;;  %v545_v55 = vrot.slane %v543_v17, 4  ;;  %v548_v59 = vrot.slane %v546_v19, 5  ;;  %v4520_v32 = vld [vmem:[%s4102_s25 + $0xac] sm:$0xf] }
  0x55   : > { %v531_v12 = vsel %vm4149_vm4, %v526_v2, %v530_v20  ;;  %v554_v41 = vrot.slane %v552_v37, 5  ;;  %v558_v43 = vrot.slane %v556_v0, 4  ;;  %v562_v35 = vshll.u32 %v4501_v58, 16 }
  0x56   : > { %v541_v53 = vsel %vm4149_vm4, %v536_v40, %v540_v44  ;;  %v1230_v18 = vsel %vm4330_vm7, %v1228_v50, %v1229_v22  ;;  %v3124_v4 = vrot.slane %v4243_v13, 9  ;;  %v549_v2 = vor.u32 %v548_v59, %v545_v55 }
  0x57   : > { %v4522_v17 = vcombine.low %v531_v12, %v541_v53  ;;  %v4524_v20 = vcombine.low %v1227_v5, %v1230_v18  ;;  %v559_v19 = vor.u32 %v558_v43, %v554_v41  ;;  %v564_v37 = vrot.slane %v562_v35, 5  ;;  %v4534_v18 = vld [vmem:[%s4102_s25 + $0xb0] sm:$0x1] }
  0x58   : > { %v1233_v0 = vrot.slane %v4250_v24, 5  ;;  %v1236_v44 = vrot.slane %v4267_v8, 5  ;;  %v567_v22 = vshrl.u32 %v4511_v25, 16  ;;  %v550_v53 = vrot.slane %v549_v2, 4 }
  0x59   : > { %5176 = vst [vmem:[#allocation19_spill] sm:$0xff] %v4522_v17  ;;  %5177 = vst [vmem:[#allocation20_spill] sm:$0xff] %v4524_v20  ;;  %3460 = vmatprep.mubr.msk.bf16.mxu1 %vm664_vm3, %v4522_v17  ;;  %3614 = vmatprep.mubr.msk.bf16.mxu0 %vm664_vm3, %v4524_v20  ;;  %v560_v40 = vrot.slane %v559_v19, 4  ;;  %v570_v43 = vshll.u32 %v4511_v25, 16  ;;  %v576_v5 = vshll.u32 %v4520_v32, 16  ;;  %v580_v12 = vshrl.u32 %v4520_v32, 16 }
  0x5a   : > { %v1234_v8 = vsel %vm4330_vm7, %v3124_v4, %v1233_v0  ;;  %v1235_v50 = vrot.slane %v1233_v0, 4  ;;  %v569_v55 = vrot.slane %v567_v22, 4  ;;  %v555_v59 = vsel %vm4149_vm4, %v550_v53, %v554_v41  ;;  %v4546_v17 = vld [vmem:[%s4102_s25 + $0xb4] sm:$0xf]  ;;  %v4558_v53 = vld [vmem:[%s4102_s25 + $0xb8] sm:$0xf] }
  0x5b   : > { %v565_v35 = vsel %vm4149_vm4, %v560_v40, %v564_v37  ;;  %v572_v2 = vrot.slane %v570_v43, 5  ;;  %v578_v19 = vrot.slane %v576_v5, 5  ;;  %v582_v0 = vrot.slane %v580_v12, 4 }
  0x5c   : > { %v4548_v20 = vcombine.low %v555_v59, %v565_v35  ;;  %v1237_v4 = vsel %vm4330_vm7, %v1235_v50, %v1236_v44  ;;  %v586_v22 = vshll.u32 %v4534_v18, 16  ;;  %v3125_v41 = vrot.slane %v4272_v42, 9  ;;  %v4564_v44 = vld [vmem:[%s4102_s25 + $0xbc] sm:$0x1] }
  0x5d   : > { %v4553_v30 = vcombine.low %v1234_v8, %v1237_v4  ;;  %v573_v63 = vor.u32 %v572_v2, %v569_v55  ;;  %v1240_v37 = vrot.slane %v4277_v6, 5  ;;  %v583_v40 = vor.u32 %v582_v0, %v578_v19 }
  0x5e   : > { %5178 = vst [vmem:[#allocation21_spill] sm:$0xff] %v4548_v20  ;;  %3461 = vmatmul.mubr.msk.bf16.gmra.mrb[24].mxu1 %vm664_vm3, %v4548_v20  ;;  %v588_v43 = vrot.slane %v586_v22, 5  ;;  %v1243_v5 = vrot.slane %v4290_v11, 5  ;;  %v591_v50 = vshrl.u32 %v4546_v17, 16  ;;  %v594_v59 = vshll.u32 %v4546_v17, 16 }
  0x5f   : > { %5179 = vst [vmem:[#allocation22_spill] sm:$0xff] %v4553_v30  ;;  %3615 = vmatmul.mubr.msk.bf16.gmra.mrb[8].mxu0 %vm664_vm3, %v4553_v30  ;;  %v574_v8 = vrot.slane %v573_v63, 4  ;;  %v1241_v55 = vsel %vm4330_vm7, %v3125_v41, %v1240_v37  ;;  %v1242_v12 = vrot.slane %v1240_v37, 4  ;;  %v584_v35 = vrot.slane %v583_v40, 4 }
  0x60   : > { %v593_v2 = vrot.slane %v591_v50, 4  ;;  %v600_v4 = vshll.u32 %v4558_v53, 16  ;;  %v604_v11 = vshrl.u32 %v4558_v53, 16  ;;  %v596_v20 = vrot.slane %v594_v59, 5 }
  0x61   : > { %v579_v0 = vsel %vm4149_vm4, %v574_v8, %v578_v19  ;;  %v1244_v22 = vsel %vm4330_vm7, %v1242_v12, %v1243_v5  ;;  %v610_v63 = vshll.u32 %v4564_v44, 16  ;;  %v589_v41 = vsel %vm4149_vm4, %v584_v35, %v588_v43 }
  0x62   : > { %v4581_v37 = vcombine.low %v1241_v55, %v1244_v22  ;;  %v602_v40 = vrot.slane %v600_v4, 5  ;;  %v606_v50 = vrot.slane %v604_v11, 4  ;;  %v4583_v30 = vcombine.low %v579_v0, %v589_v41 }
  0x63   : > { %v597_v21 = vor.u32 %v596_v20, %v593_v2  ;;  %v612_v45 = vrot.slane %v610_v63, 5  ;;  %v3126_v42 = vrot.slane %v4294_v15, 9  ;;  %v1247_v5 = vrot.slane %v4299_v27, 5 }
  0x64   : > { %3618 = vmatprep.mubr.msk.bf16.mxu0 %vm664_vm3, %v4581_v37  ;;  %v607_v19 = vor.u32 %v606_v50, %v602_v40  ;;  %v1250_v8 = vrot.slane %v4313_v47, 5  ;;  %v3127_v43 = vrot.slane %v4321_v54, 9  ;;  %3464 = vmatprep.mubr.msk.bf16.mxu1 %vm664_vm3, %v4583_v30  ;;  %v3086_v20 = vcombine.low %v4116_v9, %v4119_v10 }
  0x65   : > { %v598_v55 = vrot.slane %v597_v21, 4  ;;  %v1254_v12 = vrot.slane %v4337_v36, 5  ;;  %v1257_v59 = vrot.slane %v4350_v51, 5  ;;  %v1248_v2 = vsel %vm4330_vm7, %v3126_v42, %v1247_v5 }
  0x66   : > { %v608_v35 = vrot.slane %v607_v19, 4  ;;  %v1249_v4 = vrot.slane %v1247_v5, 4  ;;  %v1261_v47 = vrot.slane %v4378_v31, 5  ;;  %v3128_v9 = vrot.slane %v4362_v56, 9 }
  0x67   : > { %v603_v11 = vsel %vm4149_vm4, %v598_v55, %v602_v40  ;;  %v1255_v21 = vsel %vm4330_vm7, %v3127_v43, %v1254_v12  ;;  %v1256_v0 = vrot.slane %v1254_v12, 4  ;;  %v1264_v42 = vrot.slane %v4383_v49, 5 }
  0x68   : > { %v613_v10 = vsel %vm4149_vm4, %v608_v35, %v612_v45  ;;  %v1251_v51 = vsel %vm4330_vm7, %v1249_v4, %v1250_v8  ;;  %v1263_v22 = vrot.slane %v1261_v47, 4  ;;  %v3129_v19 = vrot.slane %v4409_v29, 9 }
  0x69   : > { %v4610_v63 = vcombine.low %v603_v11, %v613_v10  ;;  %v4612_v41 = vcombine.low %v1248_v2, %v1251_v51  ;;  %v1258_v40 = vsel %vm4330_vm7, %v1256_v0, %v1257_v59  ;;  %v1268_v5 = vrot.slane %v4415_v16, 5 }
  0x6a   : > { %v4616_v50 = vcombine.low %v1255_v21, %v1258_v40  ;;  %v1271_v49 = vrot.slane %v4425_v1, 5  ;;  %v1262_v45 = vsel %vm4330_vm7, %v3128_v9, %v1261_v47  ;;  %v1265_v8 = vsel %vm4330_vm7, %v1263_v22, %v1264_v42 }
  0x6b   : > { %3465 = vmatmul.mubr.msk.bf16.gmra.mrb[28].mxu1 %vm664_vm3, %v4610_v63  ;;  %3619 = vmatmul.mubr.msk.bf16.gmra.mrb[12].mxu0 %vm664_vm3, %v4612_v41  ;;  %v1270_v43 = vrot.slane %v1268_v5, 4  ;;  %v1275_v55 = vrot.slane %v4458_v46, 5  ;;  %v1282_v12 = vrot.slane %v4488_v7, 5  ;;  %v1269_v59 = vsel %vm4330_vm7, %v3129_v19, %v1268_v5 }
  0x6c   : > { %3470 = vmatprep.mubr.msk.bf16.mxu1 %vm664_vm3, %v3086_v20  ;;  %3622 = vmatprep.mubr.msk.bf16.mxu0 %vm664_vm3, %v4616_v50  ;;  %v4638_v20 = vcombine.low %v1262_v45, %v1265_v8  ;;  %v3130_v35 = vrot.slane %v4439_v61, 9  ;;  %v1278_v4 = vrot.slane %v4463_v3, 5  ;;  %v4644_v47 = vcombine.low %v4145_v33, %v4158_v39  ;;  %v4656_v3 = vld [vmem:[%s5121_s1 + $0x6] sm:$0x3] }
  0x6d   : > { %v1272_v1 = vsel %vm4330_vm7, %v1270_v43, %v1271_v49  ;;  %v1277_v2 = vrot.slane %v1275_v55, 4  ;;  %v3131_v11 = vrot.slane %v4481_v60, 9  ;;  %v1400_v21 = vsel %vm713_vm0, %v4198_v23, 0 }
  0x6e   : > { %v4649_v0 = vcombine.low %v1269_v59, %v1272_v1  ;;  %v1284_v9 = vrot.slane %v1282_v12, 4  ;;  %v1285_v10 = vrot.slane %v4501_v58, 5  ;;  %v1289_v51 = vrot.slane %v4520_v32, 5 }
  0x6f   : > { %v1276_v33 = vsel %vm4330_vm7, %v3130_v35, %v1275_v55  ;;  %v1279_v39 = vsel %vm4330_vm7, %v1277_v2, %v1278_v4  ;;  %v4670_v23 = vcombine.low %v4172_v57, %v4177_v62  ;;  %v1283_v58 = vsel %vm4330_vm7, %v3131_v11, %v1282_v12 }
  0x70   : > { %v4676_v22 = vcombine.low %v4294_v15, %v4299_v27  ;;  %v1286_v42 = vsel %vm4330_vm7, %v1284_v9, %v1285_v10  ;;  %v3132_v40 = vrot.slane %v4511_v25, 9  ;;  %v1296_v19 = vrot.slane %v4558_v53, 5 }
  0x71   : > { %v4686_v57 = vcombine.low %v4321_v54, %v4337_v36  ;;  %v4690_v62 = vcombine.low %v1276_v33, %v1279_v39  ;;  %v1291_v15 = vrot.slane %v1289_v51, 4  ;;  %v1292_v27 = vrot.slane %v4534_v18, 5  ;;  %v222_v18 = vld [vmem:[%s4102_s25 + $0xc8] sm:$0x1] }
  0x72   : > { %v4695_v5 = vcombine.low %v4362_v56, %v4378_v31  ;;  %v4699_v49 = vcombine.low %v4409_v29, %v4415_v16  ;;  %v4703_v54 = vcombine.low %v4439_v61, %v4458_v46  ;;  %v4707_v36 = vcombine.low %v4481_v60, %v4488_v7  ;;  %v4726_v61 = vld [vmem:[%s4102_s25 + $0xc4] sm:$0xf] }
  0x73   : > { %3471 = vmatmul.mubr.msk.bf16.vlgmr.msra.gmra.mrb[0].mxu1 %vm664_vm3, %v4155_v38  ;;  %3623 = vmatmul.mubr.msk.bf16.gmra.mrb[16].mxu0 %vm664_vm3, %v4638_v20  ;;  %v4711_v45 = vcombine.low %v4511_v25, %v4520_v32  ;;  %v4715_v56 = vcombine.low %v4191_v14, %v4203_v28  ;;  %v4717_v31 = vcombine.low %v1283_v58, %v1286_v42  ;;  %v3133_v16 = vrot.slane %v4546_v17, 9  ;;  %v5180_v42 = vld [vmem:[#allocation5_spill] sm:$0xff] }
  0x74   : > { %3503 = vmatpush3.bf16.msra.mxu1 %v1400_v21  ;;  %3474 = vmatprep.mubr.msk.bf16.mxu1 %vm664_vm3, %v4644_v47  ;;  %v4721_v29 = vcombine.low %v4546_v17, %v4558_v53  ;;  %v1298_v7 = vrot.slane %v1296_v19, 4  ;;  %v1299_v60 = vrot.slane %v4564_v44, 5  ;;  %v1290_v14 = vsel %vm4330_vm7, %v3132_v40, %v1289_v51  ;;  %v4746_v17 = vld [vmem:[%s4102_s25 + $0xc0] sm:$0xf] }
  0x75   : > { %3626 = vmatprep.mubr.msk.bf16.mxu0 %vm664_vm3, %v4649_v0  ;;  %4001 = vmatprep.subr.msk.bf16.mxu1 %vm713_vm0, %v4656_v3  ;;  %v1293_v28 = vsel %vm4330_vm7, %v1291_v15, %v1292_v27  ;;  %v2032_v25 = vrot.slane %v4726_v61, 5  ;;  %v1297_v46 = vsel %vm4330_vm7, %v3133_v16, %v1296_v19  ;;  %v4751_v53 = vcombine.low %v4218_v48, %v4226_v52 }
  0x76   : > { %v1300_v32 = vsel %vm4330_vm7, %v1298_v7, %v1299_v60  ;;  %v4753_v44 = vcombine.low %v1290_v14, %v1293_v28  ;;  %v4757_v8 = vcombine.low %v4243_v13, %v4250_v24  ;;  %v1802_v43 = vshrl.u32 %v4746_v17, 16  ;;  %v3259_v60 = vld [vmem:[%s5121_s1 + $0x10] sm:$0x3]  ;;  %v4035_v14 = vld [vmem:[%s4102_s25 + $0x4] sm:$0xf] }
  0x77   : > { %v1805_v55 = vshll.u32 %v4746_v17, 16  ;;  %v1811_v12 = vshll.u32 %v4726_v61, 16  ;;  %v1815_v59 = vshrl.u32 %v4726_v61, 16  ;;  %v4763_v1 = vcombine.low %v1297_v46, %v1300_v32  ;;  %v4037_v32 = vld [vmem:[%s4102_s25] sm:$0xf] }
  0x78   : > { %v3203_v35 = vrot.slane %v4746_v17, 9  ;;  %v2034_v48 = vrot.slane %v2032_v25, 4  ;;  %v2035_v52 = vrot.slane %v222_v18, 5  ;;  %v1804_v2 = vrot.slane %v1802_v43, 4 }
  0x79   : > { %v1807_v4 = vrot.slane %v1805_v55, 5  ;;  %v1813_v11 = vrot.slane %v1811_v12, 5  ;;  %v1817_v21 = vrot.slane %v1815_v59, 4  ;;  %v1821_v9 = vshll.u32 %v222_v18, 16 }
  0x7a   : > { %v2033_v10 = vsel %vm4330_vm7, %v3203_v35, %v2032_v25  ;;  %v2036_v51 = vsel %vm4330_vm7, %v2034_v48, %v2035_v52  ;;  %v4780_v40 = vcombine.low %v5180_v42, %v4277_v6  ;;  %v5181_v6 = vld [vmem:[#allocation15_spill] sm:$0xff]  ;;  %v1191_v28 = vrot.slane %v4035_v14, 5  ;;  %v5182_v48 = vld [vmem:[#allocation10_spill] sm:$0xff]  ;;  %v5183_v52 = vld [vmem:[#allocation12_spill] sm:$0xff] }
  0x7b   : > { %3475 = vmatmul.mubr.msk.bf16.gmra.mrb[4].mxu1 %vm664_vm3, %v4670_v23  ;;  %3627 = vmatmul.mubr.msk.bf16.gmra.mrb[20].mxu0 %vm664_vm3, %v4690_v62  ;;  %v1808_v13 = vor.u32 %v1807_v4, %v1804_v2  ;;  %v1818_v24 = vor.u32 %v1817_v21, %v1813_v11  ;;  %v1823_v58 = vrot.slane %v1821_v9, 5  ;;  %v4782_v19 = vcombine.low %v2033_v10, %v2036_v51  ;;  %v4036_v25 = vld [vmem:[%s4102_s25 + $0x8] sm:$0x1]  ;;  %v5185_v4 = vld [vmem:[#allocation17_spill] sm:$0xff]  ;;  %v5186_v21 = vld [vmem:[#allocation20_spill] sm:$0xff] }
  0x7c   : > { %3478 = vmatprep.mubr.msk.bf16.mxu1 %vm664_vm3, %v4715_v56  ;;  %3630 = vmatprep.mubr.msk.bf16.mxu0 %vm664_vm3, %v4717_v31  ;;  %v2480_v7 = vsel %vm713_vm0, %v5181_v6, 0  ;;  %v1194_v46 = vrot.slane %v4036_v25, 5  ;;  %v3118_v18 = vrot.slane %v4037_v32, 9  ;;  %v1193_v43 = vrot.slane %v1191_v28, 4  ;;  %v4038_v2 = vld [vmem:[%s5121_s1 + $0x8] sm:$0x3] }
  0x7d   : > { %v1809_v33 = vrot.slane %v1808_v13, 4  ;;  %v1819_v39 = vrot.slane %v1818_v24, 4  ;;  %v1606_v35 = vsel %vm713_vm0, %v4656_v3, 0  ;;  %v5184_v3 = vld [vmem:[#allocation14_spill] sm:$0xff]  ;;  %v4877_v24 = vld [vmem:[%s4102_s25 + $0xcc] sm:$0xf] }
  0x7e   : > { %v1192_v55 = vsel %vm4330_vm7, %v3118_v18, %v1191_v28  ;;  %v1195_v12 = vsel %vm4330_vm7, %v1193_v43, %v1194_v46  ;;  %v5187_v13 = vld [vmem:[#allocation22_spill] sm:$0xff]  ;;  %v4880_v9 = vld [vmem:[%s4102_s25 + $0xd0] sm:$0xf]  ;;  %v2692_v10 = vsel %vm713_vm0, %v3259_v60, 0  ;;  %v5193_v42 = vld [vmem:[#allocation9_spill] sm:$0xff]  ;;  %v2451_v14 = vshll.u32 %v4877_v24, 16 }
  0x7f   : > { %v1814_v15 = vsel %vm4149_vm4, %v1809_v33, %v1813_v11  ;;  %v1824_v27 = vsel %vm4149_vm4, %v1819_v39, %v1823_v58  ;;  %v3135_v59 = vcombine.low %v1192_v55, %v1195_v12  ;;  %v4866_v11 = vcombine.low %v4746_v17, %v4726_v61  ;;  %v5188_v17 = vld [vmem:[#allocation3_spill] sm:$0xff]  ;;  %v5189_v51 = vld [vmem:[#allocation4_spill] sm:$0xff]  ;;  %v5190_v33 = vld [vmem:[#allocation6_spill] sm:$0xff] }
  0x80   : > { %v4788_v16 = vcombine.low %v1814_v15, %v1824_v27  ;;  %v3223_v61 = vcombine.low %v4877_v24, %v4880_v9  ;;  %v5191_v39 = vld [vmem:[#allocation7_spill] sm:$0xff]  ;;  %v5192_v58 = vld [vmem:[#allocation8_spill] sm:$0xff]  ;;  %v5195_v27 = vld [vmem:[#allocation13_spill] sm:$0xff]  ;;  %v2461_v28 = vshrl.u32 %v4880_v9, 16  ;;  %v2453_v32 = vrot.slane %v2451_v14, 5 }
  0x81   : > { %v5194_v15 = vld [vmem:[#allocation11_spill] sm:$0xff]  ;;  %v5196_v6 = vld [vmem:[#allocation16_spill] sm:$0xff]  ;;  %v5198_v25 = vld [vmem:[#allocation2_spill] sm:$0xff]  ;;  %v2678_v34 = vrot.slane %v4880_v9, 5 }
  0x82   : > { %v5199_v46 = vld [vmem:[#allocation19_spill] sm:$0xff]  ;;  %v2463_v43 = vrot.slane %v2461_v28, 4  ;;  %v225_v55 = vld [vmem:[%s4102_s25 + $0xd4] sm:$0x1]  ;;  %v5200_v12 = vld [vmem:[#allocation21_spill] sm:$0xff] }
  0x83   : > { %3479 = vmatmul.mubr.msk.bf16.gmra.mrb[8].mxu1 %vm664_vm3, %v4751_v53  ;;  %3631 = vmatmul.mubr.msk.bf16.gmra.mrb[24].mxu0 %vm664_vm3, %v4753_v44 }
  0x84   : > { %3482 = vmatprep.mubr.msk.bf16.mxu1 %vm664_vm3, %v4757_v8  ;;  %3634 = vmatprep.mubr.msk.bf16.mxu0 %vm664_vm3, %v4763_v1 }
  0x8b   : > { %3483 = vmatmul.mubr.msk.bf16.gmra.mrb[12].mxu1 %vm664_vm3, %v4780_v40  ;;  %3635 = vmatmul.mubr.msk.bf16.gmra.mrb[28].mxu0 %vm664_vm3, %v4782_v19 }
  0x8c   : > { %3486 = vmatprep.mubr.msk.bf16.mxu1 %vm664_vm3, %v4676_v22  ;;  %3640 = vmatprep.mubr.msk.bf16.mxu0 %vm664_vm3, %v4644_v47 }
  0x93   : > { %3487 = vmatmul.mubr.msk.bf16.gmra.mrb[16].mxu1 %vm664_vm3, %v4686_v57  ;;  %3641 = vmatmul.mubr.msk.bf16.vlgmr.msra.gmra.mrb[0].mxu0 %vm664_vm3, %v4670_v23 }
  0x94   : > { %3673 = vmatpush3.bf16.msra.mxu0 %v2480_v7  ;;  %3490 = vmatprep.mubr.msk.bf16.mxu1 %vm664_vm3, %v4695_v5  ;;  %v5197_v7 = vld [vmem:[#allocation18_spill] sm:$0xff] }
  0x95   : > { %3644 = vmatprep.mubr.msk.bf16.mxu0 %vm664_vm3, %v4715_v56  ;;  %4007 = vmatprep.subr.msk.bf16.mxu0 %vm713_vm0, %v3259_v60  ;;  %v2448_v60 = vshrl.u32 %v4877_v24, 16 }
  0x9b   : > { %3491 = vmatmul.mubr.msk.bf16.gmra.mrb[20].mxu1 %vm664_vm3, %v4699_v49  ;;  %3645 = vmatmul.mubr.msk.bf16.gmra.mrb[4].mxu0 %vm664_vm3, %v4751_v53 }
  0x9c   : > { %3494 = vmatprep.mubr.msk.bf16.mxu1 %vm664_vm3, %v4703_v54  ;;  %3648 = vmatprep.mubr.msk.bf16.mxu0 %vm664_vm3, %v4757_v8 }
  0xa3   : > { %3495 = vmatmul.mubr.msk.bf16.gmra.mrb[24].mxu1 %vm664_vm3, %v4707_v36  ;;  %3649 = vmatmul.mubr.msk.bf16.gmra.mrb[8].mxu0 %vm664_vm3, %v4780_v40 }
  0xa4   : > { %3498 = vmatprep.mubr.msk.bf16.mxu1 %vm664_vm3, %v4711_v45  ;;  %3652 = vmatprep.mubr.msk.bf16.mxu0 %vm664_vm3, %v4676_v22 }
  0xab   : > { %3499 = vmatmul.mubr.msk.bf16.gmra.mrb[28].mxu1 %vm664_vm3, %v4721_v29  ;;  %3653 = vmatmul.mubr.msk.bf16.gmra.mrb[12].mxu0 %vm664_vm3, %v4686_v57 }
  0xac   : > { %3504 = vmatprep.mubr.msk.bf16.mxu1 %vm664_vm3, %v3135_v59  ;;  %3656 = vmatprep.mubr.msk.bf16.mxu0 %vm664_vm3, %v4695_v5 }
  0xb3   : > { %3505 = vmatmul.mubr.msk.bf16.vlgmr.msra.gmra.mrb[0].mxu1 %vm664_vm3, %v5182_v48  ;;  %3657 = vmatmul.mubr.msk.bf16.gmra.mrb[16].mxu0 %vm664_vm3, %v4699_v49 }
  0xb4   : > { %3537 = vmatpush3.bf16.msra.mxu1 %v1606_v35  ;;  %3508 = vmatprep.mubr.msk.bf16.mxu1 %vm664_vm3, %v5183_v52  ;;  %v2467_v35 = vshll.u32 %v225_v55, 16 }
  0xb5   : > { %3660 = vmatprep.mubr.msk.bf16.mxu0 %vm664_vm3, %v4703_v54  ;;  %4003 = vmatprep.subr.msk.bf16.mxu1 %vm713_vm0, %v4038_v2 }
  0xbb   : > { %3509 = vmatmul.mubr.msk.bf16.gmra.mrb[4].mxu1 %vm664_vm3, %v5184_v3  ;;  %3661 = vmatmul.mubr.msk.bf16.gmra.mrb[20].mxu0 %vm664_vm3, %v4707_v36 }
  0xbc   : > { %3512 = vmatprep.mubr.msk.bf16.mxu1 %vm664_vm3, %v5185_v4  ;;  %3664 = vmatprep.mubr.msk.bf16.mxu0 %vm664_vm3, %v4711_v45 }
  0xc3   : > { %3513 = vmatmul.mubr.msk.bf16.gmra.mrb[8].mxu1 %vm664_vm3, %v5186_v21  ;;  %3665 = vmatmul.mubr.msk.bf16.gmra.mrb[24].mxu0 %vm664_vm3, %v4721_v29 }
  0xc4   : > { %3516 = vmatprep.mubr.msk.bf16.mxu1 %vm664_vm3, %v5187_v13  ;;  %3668 = vmatprep.mubr.msk.bf16.mxu0 %vm664_vm3, %v4866_v11 }
  0xcb   : > { %3517 = vmatmul.mubr.msk.bf16.gmra.mrb[12].mxu1 %vm664_vm3, %v4581_v37  ;;  %3669 = vmatmul.mubr.msk.bf16.gmra.mrb[28].mxu0 %vm664_vm3, %v3223_v61  ;;  %v2469_v61 = vrot.slane %v2467_v35, 5 }
  0xcc   : > { %3520 = vmatprep.mubr.msk.bf16.mxu1 %vm664_vm3, %v4612_v41  ;;  %3674 = vmatprep.mubr.msk.bf16.mxu0 %vm664_vm3, %v5188_v17 }
  0xd3   : > { %3521 = vmatmul.mubr.msk.bf16.gmra.mrb[16].mxu1 %vm664_vm3, %v4616_v50  ;;  %3675 = vmatmul.mubr.msk.bf16.vlgmr.msra.gmra.mrb[0].mxu0 %vm664_vm3, %v5189_v51 }
  0xd4   : > { %3707 = vmatpush3.bf16.msra.mxu0 %v2692_v10  ;;  %3524 = vmatprep.mubr.msk.bf16.mxu1 %vm664_vm3, %v4638_v20 }
  0xd5   : > { %3678 = vmatprep.mubr.msk.bf16.mxu0 %vm664_vm3, %v5190_v33 }
  0xdb   : > { %3525 = vmatmul.mubr.msk.bf16.gmra.mrb[20].mxu1 %vm664_vm3, %v4649_v0  ;;  %3679 = vmatmul.mubr.msk.bf16.gmra.mrb[4].mxu0 %vm664_vm3, %v5191_v39 }
  0xdc   : > { %3528 = vmatprep.mubr.msk.bf16.mxu1 %vm664_vm3, %v4690_v62  ;;  %3682 = vmatprep.mubr.msk.bf16.mxu0 %vm664_vm3, %v5192_v58 }
  0xe3   : > { %3529 = vmatmul.mubr.msk.bf16.gmra.mrb[24].mxu1 %vm664_vm3, %v4717_v31  ;;  %3683 = vmatmul.mubr.msk.bf16.gmra.mrb[8].mxu0 %vm664_vm3, %v5193_v42 }
  0xe4   : > { %3532 = vmatprep.mubr.msk.bf16.mxu1 %vm664_vm3, %v4753_v44  ;;  %3686 = vmatprep.mubr.msk.bf16.mxu0 %vm664_vm3, %v5194_v15 }
  0xeb   : > { %3533 = vmatmul.mubr.msk.bf16.gmra.mrb[28].mxu1 %vm664_vm3, %v4763_v1  ;;  %3687 = vmatmul.mubr.msk.bf16.gmra.mrb[12].mxu0 %vm664_vm3, %v5195_v27 }
  0xec   : > { %3538 = vmatprep.mubr.msk.bf16.mxu1 %vm664_vm3, %v4155_v38  ;;  %3690 = vmatprep.mubr.msk.bf16.mxu0 %vm664_vm3, %v5196_v6  ;;  %v2457_v38 = vshll.u32 %v4880_v9, 16 }
  0xee   : > { %v2459_v18 = vrot.slane %v2457_v38, 5 }
  0xf0   : > { %v2464_v59 = vor.u32 %v2463_v43, %v2459_v18 }
  0xf2   : > { %v2465_v2 = vrot.slane %v2464_v59, 4 }
  0xf3   : > { %3539 = vmatmul.mubr.msk.bf16.vlgmr.msra.gmra.mrb[0].mxu1 %vm664_vm3, %v4644_v47  ;;  %3691 = vmatmul.mubr.msk.bf16.gmra.mrb[16].mxu0 %vm664_vm3, %v5197_v7  ;;  %v2450_v47 = vrot.slane %v2448_v60, 4 }
  0xf4   : > { %3741 = vmatpush3.bf16.msra.mxu1 %v5198_v25  ;;  %3542 = vmatprep.mubr.msk.bf16.mxu1 %vm664_vm3, %v4670_v23 }
  0xf5   : > { %3694 = vmatprep.mubr.msk.bf16.mxu0 %vm664_vm3, %v5199_v46  ;;  %v2454_v23 = vor.u32 %v2453_v32, %v2450_v47 }
  0xf7   : > { %v2455_v48 = vrot.slane %v2454_v23, 4 }
  0xfb   : > { %3543 = vmatmul.mubr.msk.bf16.gmra.mrb[4].mxu1 %vm664_vm3, %v4715_v56  ;;  %3695 = vmatmul.mubr.msk.bf16.gmra.mrb[20].mxu0 %vm664_vm3, %v5200_v12  ;;  %v2460_v56 = vsel %vm4149_vm4, %v2455_v48, %v2459_v18 }
  0xfc   : > { %3546 = vmatprep.mubr.msk.bf16.mxu1 %vm664_vm3, %v4751_v53  ;;  %3698 = vmatprep.mubr.msk.bf16.mxu0 %vm664_vm3, %v4583_v30  ;;  %v2470_v53 = vsel %vm4149_vm4, %v2465_v2, %v2469_v61 }
  0xfd   : > { %v3241_v17 = vcombine.low %v2460_v56, %v2470_v53 }
 0x103   : > { %3547 = vmatmul.mubr.msk.bf16.gmra.mrb[8].mxu1 %vm664_vm3, %v4757_v8  ;;  %3699 = vmatmul.mubr.msk.bf16.gmra.mrb[24].mxu0 %vm664_vm3, %v4610_v63 }
 0x104   : > { %3550 = vmatprep.mubr.msk.bf16.mxu1 %vm664_vm3, %v4780_v40  ;;  %3702 = vmatprep.mubr.msk.bf16.mxu0 %vm664_vm3, %v4788_v16 }
 0x10b   : > { %3551 = vmatmul.mubr.msk.bf16.gmra.mrb[12].mxu1 %vm664_vm3, %v4676_v22  ;;  %3703 = vmatmul.mubr.msk.bf16.gmra.mrb[28].mxu0 %vm664_vm3, %v3241_v17 }
 0x10c   : > { %3554 = vmatprep.mubr.msk.bf16.mxu1 %vm664_vm3, %v4686_v57  ;;  %3708 = vmatprep.mubr.msk.bf16.mxu0 %vm664_vm3, %v5183_v52 }
 0x113   : > { %3555 = vmatmul.mubr.msk.bf16.gmra.mrb[16].mxu1 %vm664_vm3, %v4695_v5  ;;  %3709 = vmatmul.mubr.msk.bf16.vlgmr.msra.gmra.mrb[0].mxu0 %vm664_vm3, %v5184_v3 }
 0x114   : > { %3558 = vmatprep.mubr.msk.bf16.mxu1 %vm664_vm3, %v4699_v49  ;;  %3712 = vmatprep.mubr.msk.bf16.mxu0 %vm664_vm3, %v5185_v4 }
 0x11b   : > { %3559 = vmatmul.mubr.msk.bf16.gmra.mrb[20].mxu1 %vm664_vm3, %v4703_v54  ;;  %3713 = vmatmul.mubr.msk.bf16.gmra.mrb[4].mxu0 %vm664_vm3, %v5186_v21 }
 0x11c   : > { %3562 = vmatprep.mubr.msk.bf16.mxu1 %vm664_vm3, %v4707_v36  ;;  %3716 = vmatprep.mubr.msk.bf16.mxu0 %vm664_vm3, %v5187_v13 }
 0x123   : > { %3563 = vmatmul.mubr.msk.bf16.gmra.mrb[24].mxu1 %vm664_vm3, %v4711_v45  ;;  %3717 = vmatmul.mubr.msk.bf16.gmra.mrb[8].mxu0 %vm664_vm3, %v4581_v37  ;;  %v3258_v37 = vrot.slane %v4877_v24, 9 }
 0x124   : > { %3566 = vmatprep.mubr.msk.bf16.mxu1 %vm664_vm3, %v4721_v29  ;;  %3720 = vmatprep.mubr.msk.bf16.mxu0 %vm664_vm3, %v4612_v41  ;;  %v2680_v41 = vrot.slane %v2678_v34, 4 }
 0x12b   : > { %3567 = vmatmul.mubr.msk.bf16.gmra.mrb[28].mxu1 %vm664_vm3, %v4866_v11  ;;  %3721 = vmatmul.mubr.msk.bf16.gmra.mrb[12].mxu0 %vm664_vm3, %v4616_v50  ;;  %v2681_v50 = vrot.slane %v225_v55, 5 }
 0x12c   : > { %3588 = vmatprep.mubr.msk.bf16.mxu1 %vm664_vm3, %v5195_v27  ;;  %3724 = vmatprep.mubr.msk.bf16.mxu0 %vm664_vm3, %v4638_v20  ;;  %v2679_v20 = vsel %vm4330_vm7, %v3258_v37, %v2678_v34 }
 0x133   : > { %3589 = vmatmul.mubr.msk.bf16.vlgmr.msra.gmra.mrb[16].mxu1 %vm664_vm3, %v5196_v6  ;;  %3725 = vmatmul.mubr.msk.bf16.gmra.mrb[16].mxu0 %vm664_vm3, %v4649_v0  ;;  %v2682_v0 = vsel %vm4330_vm7, %v2680_v41, %v2681_v50 }
 0x134   : > { %3592 = vmatprep.mubr.msk.bf16.mxu1 %vm664_vm3, %v5197_v7  ;;  %3728 = vmatprep.mubr.msk.bf16.mxu0 %vm664_vm3, %v4690_v62  ;;  %v3260_v22 = vcombine.low %v2679_v20, %v2682_v0 }
 0x13b   : > { %3593 = vmatmul.mubr.msk.bf16.gmra.mrb[20].mxu1 %vm664_vm3, %v5199_v46  ;;  %3729 = vmatmul.mubr.msk.bf16.gmra.mrb[20].mxu0 %vm664_vm3, %v4717_v31 }
 0x13c   : > { %3596 = vmatprep.mubr.msk.bf16.mxu1 %vm664_vm3, %v5200_v12  ;;  %3732 = vmatprep.mubr.msk.bf16.mxu0 %vm664_vm3, %v4753_v44 }
 0x143   : > { %3597 = vmatmul.mubr.msk.bf16.gmra.mrb[24].mxu1 %vm664_vm3, %v4583_v30  ;;  %3733 = vmatmul.mubr.msk.bf16.gmra.mrb[24].mxu0 %vm664_vm3, %v4763_v1 }
 0x144   : > { %3600 = vmatprep.mubr.msk.bf16.mxu1 %vm664_vm3, %v4610_v63  ;;  %3736 = vmatprep.mubr.msk.bf16.mxu0 %vm664_vm3, %v4782_v19 }
 0x14b   : > { %3601 = vmatmul.mubr.msk.bf16.gmra.mrb[28].mxu1 %vm664_vm3, %v4788_v16  ;;  %3737 = vmatmul.mubr.msk.bf16.gmra.mrb[28].mxu0 %vm664_vm3, %v3260_v22  ;;  %v5041_v16 = vld [vmem:[%s5122_s2] ss:$0 sm:$0xff] }
 0x1c6   : > { %v3540_v30 = vpop.f32.mrb[0].mxu1 }
 0x1c7   : > { %v1642_v57 = vpop.f32.mrb[1].mxu1 }
 0x1c8   : > { %v3541_v62 = vpop.f32.mrb[2].mxu1 }
 0x1c9   : > { %v1645_v63 = vpop.f32.mrb[3].mxu1 }
 0x1ce   : > { %v3544_v5 = vpop.f32.mrb[4].mxu1 }
 0x1cf   : > { %v1658_v49 = vpop.f32.mrb[5].mxu1 }
 0x1d0   : > { %v3545_v54 = vpop.f32.mrb[6].mxu1 }
 0x1d1   : > { %v1661_v36 = vpop.f32.mrb[7].mxu1 }
 0x1d6   : > { %v3548_v45 = vpop.f32.mrb[8].mxu1 }
 0x1d7   : > { %v1674_v31 = vpop.f32.mrb[9].mxu1 }
 0x1d8   : > { %v3549_v29 = vpop.f32.mrb[10].mxu1 }
 0x1d9   : > { %v1677_v26 = vpop.f32.mrb[11].mxu1 }
 0x1de   : > { %v5030_v44 = vpop.f32.mrb[12].mxu1 }
 0x1df   : > { %v5032_v8 = vpop.f32.mrb[13].mxu1 }
 0x1e0   : > { %v5034_v1 = vpop.f32.mrb[14].mxu1 }
 0x1e1   : > { %v5036_v40 = vpop.f32.mrb[15].mxu1 }
 0x1e6   : > { %v3710_v19 = vpop.f32.mrb[0].mxu0 }
 0x1e7   : > { %v3742_v52 = vadd.f32 %v3710_v19, %v3540_v30  ;;  %v2728_v3 = vpop.f32.mrb[1].mxu0 }
 0x1e8   : > { %v3743_v4 = vadd.f32 %v2728_v3, %v1642_v57  ;;  %v3711_v11 = vpop.f32.mrb[2].mxu0 }
 0x1e9   : > { %v2896_v21 = vadd.f32 %v3742_v52, %v5041_v16  ;;  %v3744_v13 = vadd.f32 %v3711_v11, %v3541_v62  ;;  %v2731_v24 = vpop.f32.mrb[3].mxu0 }
 0x1ea   : > { %v2894_v9 = vadd.f32 %v3743_v4, %v5041_v16  ;;  %v3745_v10 = vadd.f32 %v2731_v24, %v1645_v63 }
 0x1eb   : > { %v2928_v51 = vmax.f32 %v2896_v21, 0.0  ;;  %v2897_v33 = vadd.f32 %v3744_v13, %v5041_v16 }
 0x1ec   : > { %v2926_v39 = vmax.f32 %v2894_v9, 0.0  ;;  %v2895_v58 = vadd.f32 %v3745_v10, %v5041_v16 }
 0x1ed   : > { %2960 = vst [vmem:[%s5048_s18 + $0x10] sm:$0xff] %v2928_v51  ;;  %v2929_v42 = vmax.f32 %v2897_v33, 0.0 }
 0x1ee   : > { %2958 = vst [vmem:[%s5048_s18] sm:$0xff] %v2926_v39  ;;  %v2927_v15 = vmax.f32 %v2895_v58, 0.0  ;;  %v3714_v27 = vpop.f32.mrb[4].mxu0 }
 0x1ef   : > { %2961 = vst [vmem:[%s5048_s18 + $0x18] sm:$0xff] %v2929_v42  ;;  %v3746_v6 = vadd.f32 %v3714_v27, %v3544_v5  ;;  %v2744_v7 = vpop.f32.mrb[5].mxu0 }
 0x1f0   : > { %2959 = vst [vmem:[%s5048_s18 + $0x8] sm:$0xff] %v2927_v15  ;;  %v3747_v60 = vadd.f32 %v2744_v7, %v1658_v49  ;;  %v3715_v14 = vpop.f32.mrb[6].mxu0 }
 0x1f1   : > { %v2900_v28 = vadd.f32 %v3746_v6, %v5041_v16  ;;  %v3748_v25 = vadd.f32 %v3715_v14, %v3545_v54  ;;  %v2747_v38 = vpop.f32.mrb[7].mxu0 }
 0x1f2   : > { %v2898_v46 = vadd.f32 %v3747_v60, %v5041_v16  ;;  %v3749_v47 = vadd.f32 %v2747_v38, %v1661_v36 }
 0x1f3   : > { %v2932_v32 = vmax.f32 %v2900_v28, 0.0  ;;  %v2901_v18 = vadd.f32 %v3748_v25, %v5041_v16 }
 0x1f4   : > { %v2930_v43 = vmax.f32 %v2898_v46, 0.0  ;;  %v2899_v55 = vadd.f32 %v3749_v47, %v5041_v16 }
 0x1f5   : > { %2964 = vst [vmem:[%s5048_s18 + $0x30] sm:$0xff] %v2932_v32  ;;  %v2933_v12 = vmax.f32 %v2901_v18, 0.0 }
 0x1f6   : > { %2962 = vst [vmem:[%s5048_s18 + $0x20] sm:$0xff] %v2930_v43  ;;  %v2931_v23 = vmax.f32 %v2899_v55, 0.0  ;;  %v3718_v59 = vpop.f32.mrb[8].mxu0 }
 0x1f7   : > { %2965 = vst [vmem:[%s5048_s18 + $0x38] sm:$0xff] %v2933_v12  ;;  %v3750_v35 = vadd.f32 %v3718_v59, %v3548_v45  ;;  %v2760_v48 = vpop.f32.mrb[9].mxu0 }
 0x1f8   : > { %2963 = vst [vmem:[%s5048_s18 + $0x28] sm:$0xff] %v2931_v23  ;;  %v3751_v2 = vadd.f32 %v2760_v48, %v1674_v31  ;;  %v3719_v61 = vpop.f32.mrb[10].mxu0 }
 0x1f9   : > { %v2904_v56 = vadd.f32 %v3750_v35, %v5041_v16  ;;  %v3752_v53 = vadd.f32 %v3719_v61, %v3549_v29  ;;  %v2763_v17 = vpop.f32.mrb[11].mxu0 }
 0x1fa   : > { %v2902_v34 = vadd.f32 %v3751_v2, %v5041_v16  ;;  %v3753_v37 = vadd.f32 %v2763_v17, %v1677_v26 }
 0x1fb   : > { %v2936_v41 = vmax.f32 %v2904_v56, 0.0  ;;  %v2905_v50 = vadd.f32 %v3752_v53, %v5041_v16 }
 0x1fc   : > { %v2934_v20 = vmax.f32 %v2902_v34, 0.0  ;;  %v2903_v0 = vadd.f32 %v3753_v37, %v5041_v16 }
 0x1fd   : > { %2968 = vst [vmem:[%s5048_s18 + $0x50] sm:$0xff] %v2936_v41  ;;  %v2937_v22 = vmax.f32 %v2905_v50, 0.0 }
 0x1fe   : > { %2966 = vst [vmem:[%s5048_s18 + $0x40] sm:$0xff] %v2934_v20  ;;  %v2935_v30 = vmax.f32 %v2903_v0, 0.0  ;;  %v3722_v57 = vpop.f32.mrb[12].mxu0 }
 0x1ff   : > { %2969 = vst [vmem:[%s5048_s18 + $0x58] sm:$0xff] %v2937_v22  ;;  %v3754_v62 = vadd.f32 %v3722_v57, %v5030_v44  ;;  %v2776_v63 = vpop.f32.mrb[13].mxu0 }
 0x200   : > { %2967 = vst [vmem:[%s5048_s18 + $0x48] sm:$0xff] %v2935_v30  ;;  %v3755_v5 = vadd.f32 %v2776_v63, %v5032_v8  ;;  %v3723_v49 = vpop.f32.mrb[14].mxu0 }
 0x201   : > { %v2908_v54 = vadd.f32 %v3754_v62, %v5041_v16  ;;  %v3756_v36 = vadd.f32 %v3723_v49, %v5034_v1  ;;  %v2779_v45 = vpop.f32.mrb[15].mxu0 }
 0x202   : > { %v2906_v31 = vadd.f32 %v3755_v5, %v5041_v16  ;;  %v3757_v29 = vadd.f32 %v2779_v45, %v5036_v40 }
 0x203   : > { %v2940_v26 = vmax.f32 %v2908_v54, 0.0  ;;  %v2909_v44 = vadd.f32 %v3756_v36, %v5041_v16 }
 0x204   : > { %v2938_v19 = vmax.f32 %v2906_v31, 0.0  ;;  %v2907_v52 = vadd.f32 %v3757_v29, %v5041_v16 }
 0x205   : > { %2972 = vst [vmem:[%s5048_s18 + $0x70] sm:$0xff] %v2940_v26  ;;  %v2941_v8 = vmax.f32 %v2909_v44, 0.0 }
 0x206   : > { %2970 = vst [vmem:[%s5048_s18 + $0x60] sm:$0xff] %v2938_v19  ;;  %v2939_v3 = vmax.f32 %v2907_v52, 0.0  ;;  %v3590_v4 = vpop.f32.mrb[16].mxu1  ;;  %v3726_v11 = vpop.f32.mrb[16].mxu0 }
 0x207   : > { %2973 = vst [vmem:[%s5048_s18 + $0x78] sm:$0xff] %v2941_v8  ;;  %v3758_v1 = vadd.f32 %v3726_v11, %v3590_v4  ;;  %v1934_v21 = vpop.f32.mrb[17].mxu1  ;;  %v2792_v13 = vpop.f32.mrb[17].mxu0 }
 0x208   : > { %2971 = vst [vmem:[%s5048_s18 + $0x68] sm:$0xff] %v2939_v3  ;;  %v3759_v40 = vadd.f32 %v2792_v13, %v1934_v21  ;;  %v3591_v24 = vpop.f32.mrb[18].mxu1  ;;  %v3727_v9 = vpop.f32.mrb[18].mxu0 }
 0x209   : > { %v2912_v10 = vadd.f32 %v3758_v1, %v5041_v16  ;;  %v3760_v51 = vadd.f32 %v3727_v9, %v3591_v24  ;;  %v1937_v33 = vpop.f32.mrb[19].mxu1  ;;  %v2795_v39 = vpop.f32.mrb[19].mxu0 }
 0x20a   : > { %v2910_v58 = vadd.f32 %v3759_v40, %v5041_v16  ;;  %v3761_v42 = vadd.f32 %v2795_v39, %v1937_v33 }
 0x20b   : > { %v2944_v15 = vmax.f32 %v2912_v10, 0.0  ;;  %v2913_v27 = vadd.f32 %v3760_v51, %v5041_v16 }
 0x20c   : > { %v2942_v6 = vmax.f32 %v2910_v58, 0.0  ;;  %v2911_v7 = vadd.f32 %v3761_v42, %v5041_v16 }
 0x20d   : > { %2976 = vst [vmem:[%s5048_s18 + $0x90] sm:$0xff] %v2944_v15  ;;  %v2945_v60 = vmax.f32 %v2913_v27, 0.0 }
 0x20e   : > { %2974 = vst [vmem:[%s5048_s18 + $0x80] sm:$0xff] %v2942_v6  ;;  %v2943_v14 = vmax.f32 %v2911_v7, 0.0  ;;  %v3594_v28 = vpop.f32.mrb[20].mxu1  ;;  %v3730_v25 = vpop.f32.mrb[20].mxu0 }
 0x20f   : > { %2977 = vst [vmem:[%s5048_s18 + $0x98] sm:$0xff] %v2945_v60  ;;  %v3762_v38 = vadd.f32 %v3730_v25, %v3594_v28  ;;  %v1950_v46 = vpop.f32.mrb[21].mxu1  ;;  %v2808_v47 = vpop.f32.mrb[21].mxu0 }
 0x210   : > { %2975 = vst [vmem:[%s5048_s18 + $0x88] sm:$0xff] %v2943_v14  ;;  %v3763_v32 = vadd.f32 %v2808_v47, %v1950_v46  ;;  %v3595_v18 = vpop.f32.mrb[22].mxu1  ;;  %v3731_v43 = vpop.f32.mrb[22].mxu0 }
 0x211   : > { %v2916_v55 = vadd.f32 %v3762_v38, %v5041_v16  ;;  %v3764_v12 = vadd.f32 %v3731_v43, %v3595_v18  ;;  %v1953_v23 = vpop.f32.mrb[23].mxu1  ;;  %v2811_v59 = vpop.f32.mrb[23].mxu0 }
 0x212   : > { %v2914_v35 = vadd.f32 %v3763_v32, %v5041_v16  ;;  %v3765_v48 = vadd.f32 %v2811_v59, %v1953_v23 }
 0x213   : > { %v2948_v2 = vmax.f32 %v2916_v55, 0.0  ;;  %v2917_v61 = vadd.f32 %v3764_v12, %v5041_v16 }
 0x214   : > { %v2946_v56 = vmax.f32 %v2914_v35, 0.0  ;;  %v2915_v53 = vadd.f32 %v3765_v48, %v5041_v16 }
 0x215   : > { %2980 = vst [vmem:[%s5048_s18 + $0xb0] sm:$0xff] %v2948_v2  ;;  %v2949_v17 = vmax.f32 %v2917_v61, 0.0 }
 0x216   : > { %2978 = vst [vmem:[%s5048_s18 + $0xa0] sm:$0xff] %v2946_v56  ;;  %v2947_v34 = vmax.f32 %v2915_v53, 0.0  ;;  %v3598_v37 = vpop.f32.mrb[24].mxu1  ;;  %v3734_v41 = vpop.f32.mrb[24].mxu0 }
 0x217   : > { %2981 = vst [vmem:[%s5048_s18 + $0xb8] sm:$0xff] %v2949_v17  ;;  %v3766_v50 = vadd.f32 %v3734_v41, %v3598_v37  ;;  %v1966_v20 = vpop.f32.mrb[25].mxu1  ;;  %v2824_v0 = vpop.f32.mrb[25].mxu0 }
 0x218   : > { %2979 = vst [vmem:[%s5048_s18 + $0xa8] sm:$0xff] %v2947_v34  ;;  %v3767_v22 = vadd.f32 %v2824_v0, %v1966_v20  ;;  %v3599_v30 = vpop.f32.mrb[26].mxu1  ;;  %v3735_v57 = vpop.f32.mrb[26].mxu0 }
 0x219   : > { %v2920_v62 = vadd.f32 %v3766_v50, %v5041_v16  ;;  %v3768_v63 = vadd.f32 %v3735_v57, %v3599_v30  ;;  %v1969_v5 = vpop.f32.mrb[27].mxu1  ;;  %v2827_v49 = vpop.f32.mrb[27].mxu0 }
 0x21a   : > { %v2918_v54 = vadd.f32 %v3767_v22, %v5041_v16  ;;  %v3769_v36 = vadd.f32 %v2827_v49, %v1969_v5 }
 0x21b   : > { %v2952_v45 = vmax.f32 %v2920_v62, 0.0  ;;  %v2921_v31 = vadd.f32 %v3768_v63, %v5041_v16 }
 0x21c   : > { %v2950_v29 = vmax.f32 %v2918_v54, 0.0  ;;  %v2919_v26 = vadd.f32 %v3769_v36, %v5041_v16 }
 0x21d   : > { %2984 = vst [vmem:[%s5048_s18 + $0xd0] sm:$0xff] %v2952_v45  ;;  %v2953_v44 = vmax.f32 %v2921_v31, 0.0 }
 0x21e   : > { %2982 = vst [vmem:[%s5048_s18 + $0xc0] sm:$0xff] %v2950_v29  ;;  %v2951_v19 = vmax.f32 %v2919_v26, 0.0  ;;  %v3602_v52 = vpop.f32.mrb[28].mxu1  ;;  %v3738_v8 = vpop.f32.mrb[28].mxu0 }
 0x21f   : > { %2985 = vst [vmem:[%s5048_s18 + $0xd8] sm:$0xff] %v2953_v44  ;;  %v3770_v3 = vadd.f32 %v3738_v8, %v3602_v52  ;;  %v1982_v4 = vpop.f32.mrb[29].mxu1  ;;  %v2840_v11 = vpop.f32.mrb[29].mxu0 }
 0x220   : > { %2983 = vst [vmem:[%s5048_s18 + $0xc8] sm:$0xff] %v2951_v19  ;;  %v3771_v1 = vadd.f32 %v2840_v11, %v1982_v4  ;;  %v3603_v21 = vpop.f32.mrb[30].mxu1  ;;  %v3739_v13 = vpop.f32.mrb[30].mxu0 }
 0x221   : > { %v2924_v40 = vadd.f32 %v3770_v3, %v5041_v16  ;;  %v3772_v24 = vadd.f32 %v3739_v13, %v3603_v21  ;;  %v1985_v9 = vpop.f32.mrb[31].mxu1  ;;  %v2843_v10 = vpop.f32.mrb[31].mxu0 }
 0x222   : > { %v2922_v51 = vadd.f32 %v3771_v1, %v5041_v16  ;;  %v3773_v33 = vadd.f32 %v2843_v10, %v1985_v9 }
 0x223   : > { %v2956_v39 = vmax.f32 %v2924_v40, 0.0  ;;  %v2925_v58 = vadd.f32 %v3772_v24, %v5041_v16 }
 0x224   : > { %v2954_v42 = vmax.f32 %v2922_v51, 0.0  ;;  %v2923_v15 = vadd.f32 %v3773_v33, %v5041_v16 }
 0x225   : > { %2988 = vst [vmem:[%s5048_s18 + $0xf0] sm:$0xff] %v2956_v39  ;;  %v2957_v27 = vmax.f32 %v2925_v58, 0.0 }
 0x226   : > { %2986 = vst [vmem:[%s5048_s18 + $0xe0] sm:$0xff] %v2954_v42  ;;  %v2955_v6 = vmax.f32 %v2923_v15, 0.0 }
 0x227   : > { %2989 = vst [vmem:[%s5048_s18 + $0xf8] sm:$0xff] %v2957_v27 }
 0x228   : > { %2987 = vst [vmem:[%s5048_s18 + $0xe8] sm:$0xff] %v2955_v6 }
 0x229 PF: > { %s13_s12 = sadd.s32 1, %s4045_s12  }
 0x22a   : > { %p10_p4 = scmp.ge.s32.totalorder %s13_s12, 4  }
 0x22c   :  { %12 = sbr.rel (!%p10_p4) target bundleno = 1 (0x1), region = 70 }

</bundles_post_ra>
